<compile_context>
chip_gen: v5e
topology: v5e:2x2
jax: 0.10.0
libtpu: 0.0.40
codegen_flags: <defaults>
</compile_context>

<pallas_src>
import jax
import jax.numpy as jnp
from jax.experimental import pallas as pl
from jax.experimental.pallas import tpu as pltpu


# ----------------------------- fused Pallas kernel -------------------------

def _lenet_kernel(x_ref, t1_ref, b1_ref, rh1_ref, cw1_ref,
                  t2_ref, b2_ref, rh2_ref, cw2_ref,
                  g1_ref, fb1_ref, wfc2_ref, fb2_ref, wfc3_ref, fb3_ref,
                  out_ref):
    def dot(a, b):
        return jnp.dot(a, b, preferred_element_type=jnp.float32)

    x = x_ref[0]                                               # [32, 96]  rows=h, cols=ci*32+w

    # conv1 (5x5 valid) + bias + ReLU -> [28, 6*28], cols = co*28 + wo
    acc1 = dot(x[0:28, :], t1_ref[0])
    for i in range(1, 5):
        acc1 = acc1 + dot(x[i:i + 28, :], t1_ref[i])
    a1 = jnp.maximum(acc1 + b1_ref[...], 0.0)                  # [28, 168]

    # maxpool 2x2 stride 2: one-hot selection matmuls (exact), rows then columns
    pr1 = jnp.maximum(dot(rh1_ref[0], a1), dot(rh1_ref[1], a1))    # [14, 168]
    q1 = jnp.maximum(dot(pr1, cw1_ref[0]), dot(pr1, cw1_ref[1]))   # [14, 6*14]

    # conv2 (5x5 valid) + bias + ReLU -> [10, 16*10], cols = co*10 + wo
    acc2 = dot(q1[0:10, :], t2_ref[0])
    for i in range(1, 5):
        acc2 = acc2 + dot(q1[i:i + 10, :], t2_ref[i])
    a2 = jnp.maximum(acc2 + b2_ref[...], 0.0)                  # [10, 160]

    pr2 = jnp.maximum(dot(rh2_ref[0], a2), dot(rh2_ref[1], a2))    # [5, 160]
    q2 = jnp.maximum(dot(pr2, cw2_ref[0]), dot(pr2, cw2_ref[1]))   # [5, 16*5]

    # fc1 (400 -> 120): consume pooled rows with per-row weight slabs (torch CHW flatten order
    # is baked into g1 host-side), then fc2 (120 -> 84) and fc3 (84 -> 10) chained in-kernel.
    h = dot(q2[0:1, :], g1_ref[0])
    for a in range(1, 5):
        h = h + dot(q2[a:a + 1, :], g1_ref[a])
    h1 = jnp.maximum(h + fb1_ref[...], 0.0)                    # [1, 120]
    h2 = jnp.maximum(dot(h1, wfc2_ref[...]) + fb2_ref[...], 0.0)   # [1, 84]
    out_ref[0] = dot(h2, wfc3_ref[...]) + fb3_ref[...]         # [1, 10]


# --------------------------- host-side weight packing -----------------------

def _conv_toeplitz(w_oihw, in_w, out_w):
    """T[i, ci*in_w + w, co*out_w + wo] = W[co, ci, i, w - wo] if 0 <= w-wo < KW else 0."""
    co_n, ci_n, kh, kw = w_oihw.shape
    diff = jnp.arange(in_w)[:, None] - jnp.arange(out_w)[None, :]          # [in_w, out_w]
    mask = (diff >= 0) & (diff < kw)
    g = w_oihw[:, :, :, jnp.clip(diff, 0, kw - 1)]                          # [co, ci, kh, in_w, out_w]
    g = jnp.where(mask[None, None, None, :, :], g, 0.0)
    t = jnp.transpose(g, (2, 1, 3, 0, 4))                                   # [kh, ci, in_w, co, out_w]
    return t.reshape(kh, ci_n * in_w, co_n * out_w).astype(jnp.float32)


def _pool_selectors(in_hw, out_hw, channels):
    """Row selectors [2, out, in] (even/odd rows) and block-diag column selectors
    [2, channels*in, channels*out] (even/odd columns within each channel group)."""
    r = jnp.arange(out_hw)
    c = jnp.arange(in_hw)
    re = (c[None, :] == 2 * r[:, None]).astype(jnp.float32)                 # [out, in]
    ro = (c[None, :] == 2 * r[:, None] + 1).astype(jnp.float32)
    ce = (c[:, None] == 2 * r[None, :]).astype(jnp.float32)                 # [in, out]
    co_ = (c[:, None] == 2 * r[None, :] + 1).astype(jnp.float32)
    eye = jnp.eye(channels, dtype=jnp.float32)
    return (jnp.stack([re, ro]),
            jnp.stack([jnp.kron(eye, ce), jnp.kron(eye, co_)]))


def pack_params(p):
    """Build the kernel operands from PyTorch-layout parameters (run once, host-side)."""
    rh1, cw1 = _pool_selectors(28, 14, 6)                       # [2,14,28], [2,168,84]
    rh2, cw2 = _pool_selectors(10, 5, 16)                       # [2,5,10],  [2,160,80]
    # fc1 weights regrouped so that row a multiplies pooled row a, columns ordered co*5 + b.
    g1 = jnp.transpose(p["fc1_w"].reshape(120, 16, 5, 5), (2, 1, 3, 0)).reshape(5, 80, 120)
    return dict(
        t1=_conv_toeplitz(p["conv1_w"], 32, 28),                # [5, 96, 168]
        b1r=jnp.repeat(p["conv1_b"], 28)[None, :],              # [1, 168]
        rh1=rh1, cw1=cw1,
        t2=_conv_toeplitz(p["conv2_w"], 14, 10),                # [5, 84, 160]
        b2r=jnp.repeat(p["conv2_b"], 10)[None, :],              # [1, 160]
        rh2=rh2, cw2=cw2,
        g1=g1.astype(jnp.float32),
        fb1=p["fc1_b"][None, :],
        wfc2=jnp.transpose(p["fc2_w"]),                         # [120, 84]
        fb2=p["fc2_b"][None, :],
        wfc3=jnp.transpose(p["fc3_w"]),                         # [84, 10]
        fb3=p["fc3_b"][None, :],
    )


# ------------------------------- forward pass ------------------------------

def lenet_forward(x_nchw, packed):
    n = x_nchw.shape[0]
    # [N, 3, 32, 32] -> [N, 32, 3*32]: rows = image row, cols = ci*32 + w  (cheap XLA glue)
    x_mat = jnp.transpose(x_nchw, (0, 2, 1, 3)).reshape(n, 32, 96)

    def full(shape):
        return pl.BlockSpec(shape, lambda i: (0,) * len(shape))

    out = pl.pallas_call(
        _lenet_kernel,
        out_shape=jax.ShapeDtypeStruct((n, 1, 10), jnp.float32),
        grid=(n,),
        in_specs=[
            pl.BlockSpec((1, 32, 96), lambda i: (i, 0, 0)),     # per-sample input block
            full((5, 96, 168)), full((1, 168)),                 # conv1
            full((2, 14, 28)), full((2, 168, 84)),              # pool1 selectors
            full((5, 84, 160)), full((1, 160)),                 # conv2
            full((2, 5, 10)), full((2, 160, 80)),               # pool2 selectors
            full((5, 80, 120)), full((1, 120)),                 # fc1
            full((120, 84)), full((1, 84)),                     # fc2
            full((84, 10)), full((1, 10)),                      # fc3
        ],
        out_specs=pl.BlockSpec((1, 1, 10), lambda i: (i, 0, 0)),
        compiler_params=pltpu.CompilerParams(dimension_semantics=("parallel",)),
    )(x_mat, packed["t1"], packed["b1r"], packed["rh1"], packed["cw1"],
      packed["t2"], packed["b2r"], packed["rh2"], packed["cw2"],
      packed["g1"], packed["fb1"], packed["wfc2"], packed["fb2"],
      packed["wfc3"], packed["fb3"])
    return out.reshape(n, 10)


# --------------------------- pure-JAX reference -----------------------------

def reference_forward(x, p):
    dn = ("NCHW", "OIHW", "NCHW")
    y = jax.lax.conv_general_dilated(x, p["conv1_w"], (1, 1), "VALID", dimension_numbers=dn)
    y = jax.nn.relu(y + p["conv1_b"][None, :, None, None])
    y = jax.lax.reduce_window(y, -jnp.inf, jax.lax.max, (1, 1, 2, 2), (1, 1, 2, 2), "VALID")
    y = jax.lax.conv_general_dilated(y, p["conv2_w"], (1, 1), "VALID", dimension_numbers=dn)
    y = jax.nn.relu(y + p["conv2_b"][None, :, None, None])
    y = jax.lax.reduce_window(y, -jnp.inf, jax.lax.max, (1, 1, 2, 2), (1, 1, 2, 2), "VALID")
    y = y.reshape(y.shape[0], -1)                               # torch view(-1, 16*5*5)
    y = jax.nn.relu(y @ p["fc1_w"].T + p["fc1_b"])
    y = jax.nn.relu(y @ p["fc2_w"].T + p["fc2_b"])
    return y @ p["fc3_w"].T + p["fc3_b"]


# --------------------------- deterministic init -----------------------------

def init_params(key):
    def uniform(k, shape, fan_in):
        bound = 1.0 / (float(fan_in) ** 0.5)                    # PyTorch-style default init
        return jax.random.uniform(k, shape, jnp.float32, -bound, bound)

    ks = jax.random.split(key, 10)
    return {
        "conv1_w": uniform(ks[0], (6, 3, 5, 5), 3 * 5 * 5),     # PyTorch OIHW layout
        "conv1_b": uniform(ks[1], (6,), 3 * 5 * 5),
        "conv2_w": uniform(ks[2], (16, 6, 5, 5), 6 * 5 * 5),
        "conv2_b": uniform(ks[3], (16,), 6 * 5 * 5),
        "fc1_w": uniform(ks[4], (120, 400), 400),               # PyTorch [out, in] layout
        "fc1_b": uniform(ks[5], (120,), 400),
        "fc2_w": uniform(ks[6], (84, 120), 120),
        "fc2_b": uniform(ks[7], (84,), 120),
        "fc3_w": uniform(ks[8], (10, 84), 84),
        "fc3_b": uniform(ks[9], (10,), 84),
    }


if __name__ == "__main__":
    key = jax.random.PRNGKey(0)
    xkey, pkey = jax.random.split(key)
    # Net's forward implies 32x32 spatial input (16*5*5 flatten); batch = 2.
    x = jax.random.normal(xkey, (2, 3, 32, 32), jnp.float32)
    params = init_params(pkey)

    packed = pack_params(params)                                # one-time host-side packing
    out = jax.block_until_ready(jax.jit(lenet_forward)(x, packed))
    ref = jax.block_until_ready(jax.jit(reference_forward)(x, params))

    assert out.shape == (2, 10) and out.dtype == jnp.float32
    # loose tolerance: both sides may use reduced-precision MXU passes for f32 matmul/conv
    assert jnp.allclose(out, ref, rtol=2e-2, atol=2e-2)
    print("KERNEL_OK")
</pallas_src>

<mosaic_0001>
module attributes {stable_mosaic.version = 11 : i64} {
  func.func @_lenet_kernel(%arg0: i32, %arg1: memref<1x32x96xf32, #tpu.memory_space<vmem>>, %arg2: memref<5x96x168xf32, #tpu.memory_space<vmem>>, %arg3: memref<1x168xf32, #tpu.memory_space<vmem>>, %arg4: memref<2x14x28xf32, #tpu.memory_space<vmem>>, %arg5: memref<2x168x84xf32, #tpu.memory_space<vmem>>, %arg6: memref<5x84x160xf32, #tpu.memory_space<vmem>>, %arg7: memref<1x160xf32, #tpu.memory_space<vmem>>, %arg8: memref<2x5x10xf32, #tpu.memory_space<vmem>>, %arg9: memref<2x160x80xf32, #tpu.memory_space<vmem>>, %arg10: memref<5x80x120xf32, #tpu.memory_space<vmem>>, %arg11: memref<1x120xf32, #tpu.memory_space<vmem>>, %arg12: memref<120x84xf32, #tpu.memory_space<vmem>>, %arg13: memref<1x84xf32, #tpu.memory_space<vmem>>, %arg14: memref<84x10xf32, #tpu.memory_space<vmem>>, %arg15: memref<1x10xf32, #tpu.memory_space<vmem>>, %arg16: memref<1x1x10xf32, #tpu.memory_space<vmem>>) attributes {dimension_semantics = [#tpu.dimension_semantics<parallel>], iteration_bounds = array<i64: 2>, scalar_prefetch = 0 : i64, scratch_operands = 0 : i64, tpu.core_type = #tpu.core_type<tc>, window_params = [{transform_indices = @transform_0, window_bounds = array<i64: 1, 32, 96>}, {pipeline_mode = #tpu.pipeline_mode<synchronous>, transform_indices = @transform_1, window_bounds = array<i64: 5, 96, 168>}, {pipeline_mode = #tpu.pipeline_mode<synchronous>, transform_indices = @transform_2, window_bounds = array<i64: 1, 168>}, {pipeline_mode = #tpu.pipeline_mode<synchronous>, transform_indices = @transform_3, window_bounds = array<i64: 2, 14, 28>}, {pipeline_mode = #tpu.pipeline_mode<synchronous>, transform_indices = @transform_4, window_bounds = array<i64: 2, 168, 84>}, {pipeline_mode = #tpu.pipeline_mode<synchronous>, transform_indices = @transform_5, window_bounds = array<i64: 5, 84, 160>}, {pipeline_mode = #tpu.pipeline_mode<synchronous>, transform_indices = @transform_6, window_bounds = array<i64: 1, 160>}, {pipeline_mode = #tpu.pipeline_mode<synchronous>, transform_indices = @transform_7, window_bounds = array<i64: 2, 5, 10>}, {pipeline_mode = #tpu.pipeline_mode<synchronous>, transform_indices = @transform_8, window_bounds = array<i64: 2, 160, 80>}, {pipeline_mode = #tpu.pipeline_mode<synchronous>, transform_indices = @transform_9, window_bounds = array<i64: 5, 80, 120>}, {pipeline_mode = #tpu.pipeline_mode<synchronous>, transform_indices = @transform_10, window_bounds = array<i64: 1, 120>}, {pipeline_mode = #tpu.pipeline_mode<synchronous>, transform_indices = @transform_11, window_bounds = array<i64: 120, 84>}, {pipeline_mode = #tpu.pipeline_mode<synchronous>, transform_indices = @transform_12, window_bounds = array<i64: 1, 84>}, {pipeline_mode = #tpu.pipeline_mode<synchronous>, transform_indices = @transform_13, window_bounds = array<i64: 84, 10>}, {pipeline_mode = #tpu.pipeline_mode<synchronous>, transform_indices = @transform_14, window_bounds = array<i64: 1, 10>}, {transform_indices = @transform_15, window_bounds = array<i64: 1, 1, 10>}]} {
    %c0 = arith.constant 0 : index
    %c0_0 = arith.constant 0 : index
    %c0_1 = arith.constant 0 : index
    %0 = vector.load %arg1[%c0, %c0_0, %c0_1] : memref<1x32x96xf32, #tpu.memory_space<vmem>>, vector<1x32x96xf32>
    %1 = vector.shape_cast %0 : vector<1x32x96xf32> to vector<32x96xf32>
    %2 = vector.extract_strided_slice %1 {offsets = [0, 0], sizes = [28, 96], strides = [1, 1]} : vector<32x96xf32> to vector<28x96xf32>
    %c0_2 = arith.constant 0 : index
    %c0_3 = arith.constant 0 : index
    %c0_4 = arith.constant 0 : index
    %3 = vector.load %arg2[%c0_2, %c0_3, %c0_4] : memref<5x96x168xf32, #tpu.memory_space<vmem>>, vector<1x96x168xf32>
    %4 = vector.shape_cast %3 : vector<1x96x168xf32> to vector<96x168xf32>
    %cst = arith.constant dense<0.000000e+00> : vector<28x168xf32>
    %5 = tpu.matmul %2, %4, %cst {dimension_numbers = #tpu.dot_dimension_numbers<[1], [0], [0], [1], [0, 0, 1, 1], [], []>} : vector<28x96xf32>, vector<96x168xf32>, vector<28x168xf32> -> vector<28x168xf32>
    %6 = vector.extract_strided_slice %1 {offsets = [1, 0], sizes = [28, 96], strides = [1, 1]} : vector<32x96xf32> to vector<28x96xf32>
    %c1 = arith.constant 1 : index
    %c0_5 = arith.constant 0 : index
    %c0_6 = arith.constant 0 : index
    %7 = vector.load %arg2[%c1, %c0_5, %c0_6] : memref<5x96x168xf32, #tpu.memory_space<vmem>>, vector<1x96x168xf32>
    %8 = vector.shape_cast %7 : vector<1x96x168xf32> to vector<96x168xf32>
    %cst_7 = arith.constant dense<0.000000e+00> : vector<28x168xf32>
    %9 = tpu.matmul %6, %8, %cst_7 {dimension_numbers = #tpu.dot_dimension_numbers<[1], [0], [0], [1], [0, 0, 1, 1], [], []>} : vector<28x96xf32>, vector<96x168xf32>, vector<28x168xf32> -> vector<28x168xf32>
    %10 = arith.addf %5, %9 : vector<28x168xf32>
    %11 = vector.extract_strided_slice %1 {offsets = [2, 0], sizes = [28, 96], strides = [1, 1]} : vector<32x96xf32> to vector<28x96xf32>
    %c2 = arith.constant 2 : index
    %c0_8 = arith.constant 0 : index
    %c0_9 = arith.constant 0 : index
    %12 = vector.load %arg2[%c2, %c0_8, %c0_9] : memref<5x96x168xf32, #tpu.memory_space<vmem>>, vector<1x96x168xf32>
    %13 = vector.shape_cast %12 : vector<1x96x168xf32> to vector<96x168xf32>
    %cst_10 = arith.constant dense<0.000000e+00> : vector<28x168xf32>
    %14 = tpu.matmul %11, %13, %cst_10 {dimension_numbers = #tpu.dot_dimension_numbers<[1], [0], [0], [1], [0, 0, 1, 1], [], []>} : vector<28x96xf32>, vector<96x168xf32>, vector<28x168xf32> -> vector<28x168xf32>
    %15 = arith.addf %10, %14 : vector<28x168xf32>
    %16 = vector.extract_strided_slice %1 {offsets = [3, 0], sizes = [28, 96], strides = [1, 1]} : vector<32x96xf32> to vector<28x96xf32>
    %c3 = arith.constant 3 : index
    %c0_11 = arith.constant 0 : index
    %c0_12 = arith.constant 0 : index
    %17 = vector.load %arg2[%c3, %c0_11, %c0_12] : memref<5x96x168xf32, #tpu.memory_space<vmem>>, vector<1x96x168xf32>
    %18 = vector.shape_cast %17 : vector<1x96x168xf32> to vector<96x168xf32>
    %cst_13 = arith.constant dense<0.000000e+00> : vector<28x168xf32>
    %19 = tpu.matmul %16, %18, %cst_13 {dimension_numbers = #tpu.dot_dimension_numbers<[1], [0], [0], [1], [0, 0, 1, 1], [], []>} : vector<28x96xf32>, vector<96x168xf32>, vector<28x168xf32> -> vector<28x168xf32>
    %20 = arith.addf %15, %19 : vector<28x168xf32>
    %21 = vector.extract_strided_slice %1 {offsets = [4, 0], sizes = [28, 96], strides = [1, 1]} : vector<32x96xf32> to vector<28x96xf32>
    %c4 = arith.constant 4 : index
    %c0_14 = arith.constant 0 : index
    %c0_15 = arith.constant 0 : index
    %22 = vector.load %arg2[%c4, %c0_14, %c0_15] : memref<5x96x168xf32, #tpu.memory_space<vmem>>, vector<1x96x168xf32>
    %23 = vector.shape_cast %22 : vector<1x96x168xf32> to vector<96x168xf32>
    %cst_16 = arith.constant dense<0.000000e+00> : vector<28x168xf32>
    %24 = tpu.matmul %21, %23, %cst_16 {dimension_numbers = #tpu.dot_dimension_numbers<[1], [0], [0], [1], [0, 0, 1, 1], [], []>} : vector<28x96xf32>, vector<96x168xf32>, vector<28x168xf32> -> vector<28x168xf32>
    %25 = arith.addf %20, %24 : vector<28x168xf32>
    %c0_17 = arith.constant 0 : index
    %c0_18 = arith.constant 0 : index
    %26 = vector.load %arg3[%c0_17, %c0_18] : memref<1x168xf32, #tpu.memory_space<vmem>>, vector<1x168xf32>
    %27 = vector.broadcast %26 : vector<1x168xf32> to vector<28x168xf32>
    %28 = arith.addf %25, %27 : vector<28x168xf32>
    %cst_19 = arith.constant 0.000000e+00 : f32
    %29 = vector.broadcast %cst_19 : f32 to vector<28x168xf32>
    %30 = arith.maximumf %28, %29 : vector<28x168xf32>
    %c0_20 = arith.constant 0 : index
    %c0_21 = arith.constant 0 : index
    %c0_22 = arith.constant 0 : index
    %31 = vector.load %arg4[%c0_20, %c0_21, %c0_22] : memref<2x14x28xf32, #tpu.memory_space<vmem>>, vector<1x14x28xf32>
    %32 = vector.shape_cast %31 : vector<1x14x28xf32> to vector<14x28xf32>
    %cst_23 = arith.constant dense<0.000000e+00> : vector<14x168xf32>
    %33 = tpu.matmul %32, %30, %cst_23 {dimension_numbers = #tpu.dot_dimension_numbers<[1], [0], [0], [1], [0, 0, 1, 1], [], []>} : vector<14x28xf32>, vector<28x168xf32>, vector<14x168xf32> -> vector<14x168xf32>
    %c1_24 = arith.constant 1 : index
    %c0_25 = arith.constant 0 : index
    %c0_26 = arith.constant 0 : index
    %34 = vector.load %arg4[%c1_24, %c0_25, %c0_26] : memref<2x14x28xf32, #tpu.memory_space<vmem>>, vector<1x14x28xf32>
    %35 = vector.shape_cast %34 : vector<1x14x28xf32> to vector<14x28xf32>
    %cst_27 = arith.constant dense<0.000000e+00> : vector<14x168xf32>
    %36 = tpu.matmul %35, %30, %cst_27 {dimension_numbers = #tpu.dot_dimension_numbers<[1], [0], [0], [1], [0, 0, 1, 1], [], []>} : vector<14x28xf32>, vector<28x168xf32>, vector<14x168xf32> -> vector<14x168xf32>
    %37 = arith.maximumf %33, %36 : vector<14x168xf32>
    %c0_28 = arith.constant 0 : index
    %c0_29 = arith.constant 0 : index
    %c0_30 = arith.constant 0 : index
    %38 = vector.load %arg5[%c0_28, %c0_29, %c0_30] : memref<2x168x84xf32, #tpu.memory_space<vmem>>, vector<1x168x84xf32>
    %39 = vector.shape_cast %38 : vector<1x168x84xf32> to vector<168x84xf32>
    %cst_31 = arith.constant dense<0.000000e+00> : vector<14x84xf32>
    %40 = tpu.matmul %37, %39, %cst_31 {dimension_numbers = #tpu.dot_dimension_numbers<[1], [0], [0], [1], [0, 0, 1, 1], [], []>} : vector<14x168xf32>, vector<168x84xf32>, vector<14x84xf32> -> vector<14x84xf32>
    %c1_32 = arith.constant 1 : index
    %c0_33 = arith.constant 0 : index
    %c0_34 = arith.constant 0 : index
    %41 = vector.load %arg5[%c1_32, %c0_33, %c0_34] : memref<2x168x84xf32, #tpu.memory_space<vmem>>, vector<1x168x84xf32>
    %42 = vector.shape_cast %41 : vector<1x168x84xf32> to vector<168x84xf32>
    %cst_35 = arith.constant dense<0.000000e+00> : vector<14x84xf32>
    %43 = tpu.matmul %37, %42, %cst_35 {dimension_numbers = #tpu.dot_dimension_numbers<[1], [0], [0], [1], [0, 0, 1, 1], [], []>} : vector<14x168xf32>, vector<168x84xf32>, vector<14x84xf32> -> vector<14x84xf32>
    %44 = arith.maximumf %40, %43 : vector<14x84xf32>
    %45 = vector.extract_strided_slice %44 {offsets = [0, 0], sizes = [10, 84], strides = [1, 1]} : vector<14x84xf32> to vector<10x84xf32>
    %c0_36 = arith.constant 0 : index
    %c0_37 = arith.constant 0 : index
    %c0_38 = arith.constant 0 : index
    %46 = vector.load %arg6[%c0_36, %c0_37, %c0_38] : memref<5x84x160xf32, #tpu.memory_space<vmem>>, vector<1x84x160xf32>
    %47 = vector.shape_cast %46 : vector<1x84x160xf32> to vector<84x160xf32>
    %cst_39 = arith.constant dense<0.000000e+00> : vector<10x160xf32>
    %48 = tpu.matmul %45, %47, %cst_39 {dimension_numbers = #tpu.dot_dimension_numbers<[1], [0], [0], [1], [0, 0, 1, 1], [], []>} : vector<10x84xf32>, vector<84x160xf32>, vector<10x160xf32> -> vector<10x160xf32>
    %49 = vector.extract_strided_slice %44 {offsets = [1, 0], sizes = [10, 84], strides = [1, 1]} : vector<14x84xf32> to vector<10x84xf32>
    %c1_40 = arith.constant 1 : index
    %c0_41 = arith.constant 0 : index
    %c0_42 = arith.constant 0 : index
    %50 = vector.load %arg6[%c1_40, %c0_41, %c0_42] : memref<5x84x160xf32, #tpu.memory_space<vmem>>, vector<1x84x160xf32>
    %51 = vector.shape_cast %50 : vector<1x84x160xf32> to vector<84x160xf32>
    %cst_43 = arith.constant dense<0.000000e+00> : vector<10x160xf32>
    %52 = tpu.matmul %49, %51, %cst_43 {dimension_numbers = #tpu.dot_dimension_numbers<[1], [0], [0], [1], [0, 0, 1, 1], [], []>} : vector<10x84xf32>, vector<84x160xf32>, vector<10x160xf32> -> vector<10x160xf32>
    %53 = arith.addf %48, %52 : vector<10x160xf32>
    %54 = vector.extract_strided_slice %44 {offsets = [2, 0], sizes = [10, 84], strides = [1, 1]} : vector<14x84xf32> to vector<10x84xf32>
    %c2_44 = arith.constant 2 : index
    %c0_45 = arith.constant 0 : index
    %c0_46 = arith.constant 0 : index
    %55 = vector.load %arg6[%c2_44, %c0_45, %c0_46] : memref<5x84x160xf32, #tpu.memory_space<vmem>>, vector<1x84x160xf32>
    %56 = vector.shape_cast %55 : vector<1x84x160xf32> to vector<84x160xf32>
    %cst_47 = arith.constant dense<0.000000e+00> : vector<10x160xf32>
    %57 = tpu.matmul %54, %56, %cst_47 {dimension_numbers = #tpu.dot_dimension_numbers<[1], [0], [0], [1], [0, 0, 1, 1], [], []>} : vector<10x84xf32>, vector<84x160xf32>, vector<10x160xf32> -> vector<10x160xf32>
    %58 = arith.addf %53, %57 : vector<10x160xf32>
    %59 = vector.extract_strided_slice %44 {offsets = [3, 0], sizes = [10, 84], strides = [1, 1]} : vector<14x84xf32> to vector<10x84xf32>
    %c3_48 = arith.constant 3 : index
    %c0_49 = arith.constant 0 : index
    %c0_50 = arith.constant 0 : index
    %60 = vector.load %arg6[%c3_48, %c0_49, %c0_50] : memref<5x84x160xf32, #tpu.memory_space<vmem>>, vector<1x84x160xf32>
    %61 = vector.shape_cast %60 : vector<1x84x160xf32> to vector<84x160xf32>
    %cst_51 = arith.constant dense<0.000000e+00> : vector<10x160xf32>
    %62 = tpu.matmul %59, %61, %cst_51 {dimension_numbers = #tpu.dot_dimension_numbers<[1], [0], [0], [1], [0, 0, 1, 1], [], []>} : vector<10x84xf32>, vector<84x160xf32>, vector<10x160xf32> -> vector<10x160xf32>
    %63 = arith.addf %58, %62 : vector<10x160xf32>
    %64 = vector.extract_strided_slice %44 {offsets = [4, 0], sizes = [10, 84], strides = [1, 1]} : vector<14x84xf32> to vector<10x84xf32>
    %c4_52 = arith.constant 4 : index
    %c0_53 = arith.constant 0 : index
    %c0_54 = arith.constant 0 : index
    %65 = vector.load %arg6[%c4_52, %c0_53, %c0_54] : memref<5x84x160xf32, #tpu.memory_space<vmem>>, vector<1x84x160xf32>
    %66 = vector.shape_cast %65 : vector<1x84x160xf32> to vector<84x160xf32>
    %cst_55 = arith.constant dense<0.000000e+00> : vector<10x160xf32>
    %67 = tpu.matmul %64, %66, %cst_55 {dimension_numbers = #tpu.dot_dimension_numbers<[1], [0], [0], [1], [0, 0, 1, 1], [], []>} : vector<10x84xf32>, vector<84x160xf32>, vector<10x160xf32> -> vector<10x160xf32>
    %68 = arith.addf %63, %67 : vector<10x160xf32>
    %c0_56 = arith.constant 0 : index
    %c0_57 = arith.constant 0 : index
    %69 = vector.load %arg7[%c0_56, %c0_57] : memref<1x160xf32, #tpu.memory_space<vmem>>, vector<1x160xf32>
    %70 = vector.broadcast %69 : vector<1x160xf32> to vector<10x160xf32>
    %71 = arith.addf %68, %70 : vector<10x160xf32>
    %cst_58 = arith.constant 0.000000e+00 : f32
    %72 = vector.broadcast %cst_58 : f32 to vector<10x160xf32>
    %73 = arith.maximumf %71, %72 : vector<10x160xf32>
    %c0_59 = arith.constant 0 : index
    %c0_60 = arith.constant 0 : index
    %c0_61 = arith.constant 0 : index
    %74 = vector.load %arg8[%c0_59, %c0_60, %c0_61] : memref<2x5x10xf32, #tpu.memory_space<vmem>>, vector<1x5x10xf32>
    %75 = vector.shape_cast %74 : vector<1x5x10xf32> to vector<5x10xf32>
    %cst_62 = arith.constant dense<0.000000e+00> : vector<5x160xf32>
    %76 = tpu.matmul %75, %73, %cst_62 {dimension_numbers = #tpu.dot_dimension_numbers<[1], [0], [0], [1], [0, 0, 1, 1], [], []>} : vector<5x10xf32>, vector<10x160xf32>, vector<5x160xf32> -> vector<5x160xf32>
    %c1_63 = arith.constant 1 : index
    %c0_64 = arith.constant 0 : index
    %c0_65 = arith.constant 0 : index
    %77 = vector.load %arg8[%c1_63, %c0_64, %c0_65] : memref<2x5x10xf32, #tpu.memory_space<vmem>>, vector<1x5x10xf32>
    %78 = vector.shape_cast %77 : vector<1x5x10xf32> to vector<5x10xf32>
    %cst_66 = arith.constant dense<0.000000e+00> : vector<5x160xf32>
    %79 = tpu.matmul %78, %73, %cst_66 {dimension_numbers = #tpu.dot_dimension_numbers<[1], [0], [0], [1], [0, 0, 1, 1], [], []>} : vector<5x10xf32>, vector<10x160xf32>, vector<5x160xf32> -> vector<5x160xf32>
    %80 = arith.maximumf %76, %79 : vector<5x160xf32>
    %c0_67 = arith.constant 0 : index
    %c0_68 = arith.constant 0 : index
    %c0_69 = arith.constant 0 : index
    %81 = vector.load %arg9[%c0_67, %c0_68, %c0_69] : memref<2x160x80xf32, #tpu.memory_space<vmem>>, vector<1x160x80xf32>
    %82 = vector.shape_cast %81 : vector<1x160x80xf32> to vector<160x80xf32>
    %cst_70 = arith.constant dense<0.000000e+00> : vector<5x80xf32>
    %83 = tpu.matmul %80, %82, %cst_70 {dimension_numbers = #tpu.dot_dimension_numbers<[1], [0], [0], [1], [0, 0, 1, 1], [], []>} : vector<5x160xf32>, vector<160x80xf32>, vector<5x80xf32> -> vector<5x80xf32>
    %c1_71 = arith.constant 1 : index
    %c0_72 = arith.constant 0 : index
    %c0_73 = arith.constant 0 : index
    %84 = vector.load %arg9[%c1_71, %c0_72, %c0_73] : memref<2x160x80xf32, #tpu.memory_space<vmem>>, vector<1x160x80xf32>
    %85 = vector.shape_cast %84 : vector<1x160x80xf32> to vector<160x80xf32>
    %cst_74 = arith.constant dense<0.000000e+00> : vector<5x80xf32>
    %86 = tpu.matmul %80, %85, %cst_74 {dimension_numbers = #tpu.dot_dimension_numbers<[1], [0], [0], [1], [0, 0, 1, 1], [], []>} : vector<5x160xf32>, vector<160x80xf32>, vector<5x80xf32> -> vector<5x80xf32>
    %87 = arith.maximumf %83, %86 : vector<5x80xf32>
    %88 = vector.extract_strided_slice %87 {offsets = [0, 0], sizes = [1, 80], strides = [1, 1]} : vector<5x80xf32> to vector<1x80xf32>
    %c0_75 = arith.constant 0 : index
    %c0_76 = arith.constant 0 : index
    %c0_77 = arith.constant 0 : index
    %89 = vector.load %arg10[%c0_75, %c0_76, %c0_77] : memref<5x80x120xf32, #tpu.memory_space<vmem>>, vector<1x80x120xf32>
    %90 = vector.shape_cast %89 : vector<1x80x120xf32> to vector<80x120xf32>
    %cst_78 = arith.constant dense<0.000000e+00> : vector<1x120xf32>
    %91 = tpu.matmul %88, %90, %cst_78 {dimension_numbers = #tpu.dot_dimension_numbers<[1], [0], [0], [1], [0, 0, 1, 1], [], []>} : vector<1x80xf32>, vector<80x120xf32>, vector<1x120xf32> -> vector<1x120xf32>
    %92 = vector.extract_strided_slice %87 {offsets = [1, 0], sizes = [1, 80], strides = [1, 1]} : vector<5x80xf32> to vector<1x80xf32>
    %c1_79 = arith.constant 1 : index
    %c0_80 = arith.constant 0 : index
    %c0_81 = arith.constant 0 : index
    %93 = vector.load %arg10[%c1_79, %c0_80, %c0_81] : memref<5x80x120xf32, #tpu.memory_space<vmem>>, vector<1x80x120xf32>
    %94 = vector.shape_cast %93 : vector<1x80x120xf32> to vector<80x120xf32>
    %cst_82 = arith.constant dense<0.000000e+00> : vector<1x120xf32>
    %95 = tpu.matmul %92, %94, %cst_82 {dimension_numbers = #tpu.dot_dimension_numbers<[1], [0], [0], [1], [0, 0, 1, 1], [], []>} : vector<1x80xf32>, vector<80x120xf32>, vector<1x120xf32> -> vector<1x120xf32>
    %96 = arith.addf %91, %95 : vector<1x120xf32>
    %97 = vector.extract_strided_slice %87 {offsets = [2, 0], sizes = [1, 80], strides = [1, 1]} : vector<5x80xf32> to vector<1x80xf32>
    %c2_83 = arith.constant 2 : index
    %c0_84 = arith.constant 0 : index
    %c0_85 = arith.constant 0 : index
    %98 = vector.load %arg10[%c2_83, %c0_84, %c0_85] : memref<5x80x120xf32, #tpu.memory_space<vmem>>, vector<1x80x120xf32>
    %99 = vector.shape_cast %98 : vector<1x80x120xf32> to vector<80x120xf32>
    %cst_86 = arith.constant dense<0.000000e+00> : vector<1x120xf32>
    %100 = tpu.matmul %97, %99, %cst_86 {dimension_numbers = #tpu.dot_dimension_numbers<[1], [0], [0], [1], [0, 0, 1, 1], [], []>} : vector<1x80xf32>, vector<80x120xf32>, vector<1x120xf32> -> vector<1x120xf32>
    %101 = arith.addf %96, %100 : vector<1x120xf32>
    %102 = vector.extract_strided_slice %87 {offsets = [3, 0], sizes = [1, 80], strides = [1, 1]} : vector<5x80xf32> to vector<1x80xf32>
    %c3_87 = arith.constant 3 : index
    %c0_88 = arith.constant 0 : index
    %c0_89 = arith.constant 0 : index
    %103 = vector.load %arg10[%c3_87, %c0_88, %c0_89] : memref<5x80x120xf32, #tpu.memory_space<vmem>>, vector<1x80x120xf32>
    %104 = vector.shape_cast %103 : vector<1x80x120xf32> to vector<80x120xf32>
    %cst_90 = arith.constant dense<0.000000e+00> : vector<1x120xf32>
    %105 = tpu.matmul %102, %104, %cst_90 {dimension_numbers = #tpu.dot_dimension_numbers<[1], [0], [0], [1], [0, 0, 1, 1], [], []>} : vector<1x80xf32>, vector<80x120xf32>, vector<1x120xf32> -> vector<1x120xf32>
    %106 = arith.addf %101, %105 : vector<1x120xf32>
    %107 = vector.extract_strided_slice %87 {offsets = [4, 0], sizes = [1, 80], strides = [1, 1]} : vector<5x80xf32> to vector<1x80xf32>
    %c4_91 = arith.constant 4 : index
    %c0_92 = arith.constant 0 : index
    %c0_93 = arith.constant 0 : index
    %108 = vector.load %arg10[%c4_91, %c0_92, %c0_93] : memref<5x80x120xf32, #tpu.memory_space<vmem>>, vector<1x80x120xf32>
    %109 = vector.shape_cast %108 : vector<1x80x120xf32> to vector<80x120xf32>
    %cst_94 = arith.constant dense<0.000000e+00> : vector<1x120xf32>
    %110 = tpu.matmul %107, %109, %cst_94 {dimension_numbers = #tpu.dot_dimension_numbers<[1], [0], [0], [1], [0, 0, 1, 1], [], []>} : vector<1x80xf32>, vector<80x120xf32>, vector<1x120xf32> -> vector<1x120xf32>
    %111 = arith.addf %106, %110 : vector<1x120xf32>
    %c0_95 = arith.constant 0 : index
    %c0_96 = arith.constant 0 : index
    %112 = vector.load %arg11[%c0_95, %c0_96] : memref<1x120xf32, #tpu.memory_space<vmem>>, vector<1x120xf32>
    %113 = arith.addf %111, %112 : vector<1x120xf32>
    %cst_97 = arith.constant 0.000000e+00 : f32
    %114 = vector.broadcast %cst_97 : f32 to vector<1x120xf32>
    %115 = arith.maximumf %113, %114 : vector<1x120xf32>
    %c0_98 = arith.constant 0 : index
    %c0_99 = arith.constant 0 : index
    %116 = vector.load %arg12[%c0_98, %c0_99] : memref<120x84xf32, #tpu.memory_space<vmem>>, vector<120x84xf32>
    %cst_100 = arith.constant dense<0.000000e+00> : vector<1x84xf32>
    %117 = tpu.matmul %115, %116, %cst_100 {dimension_numbers = #tpu.dot_dimension_numbers<[1], [0], [0], [1], [0, 0, 1, 1], [], []>} : vector<1x120xf32>, vector<120x84xf32>, vector<1x84xf32> -> vector<1x84xf32>
    %c0_101 = arith.constant 0 : index
    %c0_102 = arith.constant 0 : index
    %118 = vector.load %arg13[%c0_101, %c0_102] : memref<1x84xf32, #tpu.memory_space<vmem>>, vector<1x84xf32>
    %119 = arith.addf %117, %118 : vector<1x84xf32>
    %cst_103 = arith.constant 0.000000e+00 : f32
    %120 = vector.broadcast %cst_103 : f32 to vector<1x84xf32>
    %121 = arith.maximumf %119, %120 : vector<1x84xf32>
    %c0_104 = arith.constant 0 : index
    %c0_105 = arith.constant 0 : index
    %122 = vector.load %arg14[%c0_104, %c0_105] : memref<84x10xf32, #tpu.memory_space<vmem>>, vector<84x10xf32>
    %cst_106 = arith.constant dense<0.000000e+00> : vector<1x10xf32>
    %123 = tpu.matmul %121, %122, %cst_106 {dimension_numbers = #tpu.dot_dimension_numbers<[1], [0], [0], [1], [0, 0, 1, 1], [], []>} : vector<1x84xf32>, vector<84x10xf32>, vector<1x10xf32> -> vector<1x10xf32>
    %c0_107 = arith.constant 0 : index
    %c0_108 = arith.constant 0 : index
    %124 = vector.load %arg15[%c0_107, %c0_108] : memref<1x10xf32, #tpu.memory_space<vmem>>, vector<1x10xf32>
    %125 = arith.addf %123, %124 : vector<1x10xf32>
    %c0_109 = arith.constant 0 : index
    %c0_110 = arith.constant 0 : index
    %c0_111 = arith.constant 0 : index
    %126 = vector.load %arg16[%c0_109, %c0_110, %c0_111] : memref<1x1x10xf32, #tpu.memory_space<vmem>>, vector<1x1x10xf32>
    %127 = vector.shape_cast %126 : vector<1x1x10xf32> to vector<1x10xf32>
    %128 = vector.shape_cast %125 : vector<1x10xf32> to vector<1x1x10xf32>
    tpu.vector_store %arg16[%c0_109, %c0_110, %c0_111], %128 {strides = array<i32>} : memref<1x1x10xf32, #tpu.memory_space<vmem>>, vector<1x1x10xf32>,
    return
  }
  func.func @transform_0(%arg0: i32) -> (i32, i32, i32) {
    %c0_i32 = arith.constant 0 : i32
    %c0_i32_0 = arith.constant 0 : i32
    %c0_i32_1 = arith.constant 0 : i32
    return %arg0, %c0_i32, %c0_i32_0 : i32, i32, i32
  }
  func.func @transform_1(%arg0: i32) -> (i32, i32, i32) {
    %c0_i32 = arith.constant 0 : i32
    %c0_i32_0 = arith.constant 0 : i32
    %c0_i32_1 = arith.constant 0 : i32
    %c0_i32_2 = arith.constant 0 : i32
    return %c0_i32, %c0_i32_0, %c0_i32_1 : i32, i32, i32
  }
  func.func @transform_2(%arg0: i32) -> (i32, i32) {
    %c0_i32 = arith.constant 0 : i32
    %c0_i32_0 = arith.constant 0 : i32
    %c0_i32_1 = arith.constant 0 : i32
    return %c0_i32, %c0_i32_0 : i32, i32
  }
  func.func @transform_3(%arg0: i32) -> (i32, i32, i32) {
    %c0_i32 = arith.constant 0 : i32
    %c0_i32_0 = arith.constant 0 : i32
    %c0_i32_1 = arith.constant 0 : i32
    %c0_i32_2 = arith.constant 0 : i32
    return %c0_i32, %c0_i32_0, %c0_i32_1 : i32, i32, i32
  }
  func.func @transform_4(%arg0: i32) -> (i32, i32, i32) {
    %c0_i32 = arith.constant 0 : i32
    %c0_i32_0 = arith.constant 0 : i32
    %c0_i32_1 = arith.constant 0 : i32
    %c0_i32_2 = arith.constant 0 : i32
    return %c0_i32, %c0_i32_0, %c0_i32_1 : i32, i32, i32
  }
  func.func @transform_5(%arg0: i32) -> (i32, i32, i32) {
    %c0_i32 = arith.constant 0 : i32
    %c0_i32_0 = arith.constant 0 : i32
    %c0_i32_1 = arith.constant 0 : i32
    %c0_i32_2 = arith.constant 0 : i32
    return %c0_i32, %c0_i32_0, %c0_i32_1 : i32, i32, i32
  }
  func.func @transform_6(%arg0: i32) -> (i32, i32) {
    %c0_i32 = arith.constant 0 : i32
    %c0_i32_0 = arith.constant 0 : i32
    %c0_i32_1 = arith.constant 0 : i32
    return %c0_i32, %c0_i32_0 : i32, i32
  }
  func.func @transform_7(%arg0: i32) -> (i32, i32, i32) {
    %c0_i32 = arith.constant 0 : i32
    %c0_i32_0 = arith.constant 0 : i32
    %c0_i32_1 = arith.constant 0 : i32
    %c0_i32_2 = arith.constant 0 : i32
    return %c0_i32, %c0_i32_0, %c0_i32_1 : i32, i32, i32
  }
  func.func @transform_8(%arg0: i32) -> (i32, i32, i32) {
    %c0_i32 = arith.constant 0 : i32
    %c0_i32_0 = arith.constant 0 : i32
    %c0_i32_1 = arith.constant 0 : i32
    %c0_i32_2 = arith.constant 0 : i32
    return %c0_i32, %c0_i32_0, %c0_i32_1 : i32, i32, i32
  }
  func.func @transform_9(%arg0: i32) -> (i32, i32, i32) {
    %c0_i32 = arith.constant 0 : i32
    %c0_i32_0 = arith.constant 0 : i32
    %c0_i32_1 = arith.constant 0 : i32
    %c0_i32_2 = arith.constant 0 : i32
    return %c0_i32, %c0_i32_0, %c0_i32_1 : i32, i32, i32
  }
  func.func @transform_10(%arg0: i32) -> (i32, i32) {
    %c0_i32 = arith.constant 0 : i32
    %c0_i32_0 = arith.constant 0 : i32
    %c0_i32_1 = arith.constant 0 : i32
    return %c0_i32, %c0_i32_0 : i32, i32
  }
  func.func @transform_11(%arg0: i32) -> (i32, i32) {
    %c0_i32 = arith.constant 0 : i32
    %c0_i32_0 = arith.constant 0 : i32
    %c0_i32_1 = arith.constant 0 : i32
    return %c0_i32, %c0_i32_0 : i32, i32
  }
  func.func @transform_12(%arg0: i32) -> (i32, i32) {
    %c0_i32 = arith.constant 0 : i32
    %c0_i32_0 = arith.constant 0 : i32
    %c0_i32_1 = arith.constant 0 : i32
    return %c0_i32, %c0_i32_0 : i32, i32
  }
  func.func @transform_13(%arg0: i32) -> (i32, i32) {
    %c0_i32 = arith.constant 0 : i32
    %c0_i32_0 = arith.constant 0 : i32
    %c0_i32_1 = arith.constant 0 : i32
    return %c0_i32, %c0_i32_0 : i32, i32
  }
  func.func @transform_14(%arg0: i32) -> (i32, i32) {
    %c0_i32 = arith.constant 0 : i32
    %c0_i32_0 = arith.constant 0 : i32
    %c0_i32_1 = arith.constant 0 : i32
    return %c0_i32, %c0_i32_0 : i32, i32
  }
  func.func @transform_15(%arg0: i32) -> (i32, i32, i32) {
    %c0_i32 = arith.constant 0 : i32
    %c0_i32_0 = arith.constant 0 : i32
    %c0_i32_1 = arith.constant 0 : i32
    return %arg0, %c0_i32, %c0_i32_0 : i32, i32, i32
  }
}

</mosaic_0001>

<bundles_post_ra>
// kernel: lenet_forward.1
= control target key start
LH: loop header
LB: loop body
LE: loop exit
PB: predicated region body
PF: predicated region fallthrough
CT: control target
= control target key end

     0   :  { %s4303_s0 = inlined_call_operand.vmem [shape: f32[2,32,96], index: 0, kind: input, shape index: {}]   ;;  %s4304_s1 = inlined_call_operand.vmem [shape: f32[5,96,168], index: 1, kind: input, shape index: {}]   ;;  %s4305_s2 = inlined_call_operand.vmem [shape: f32[1,168], index: 2, kind: input, shape index: {}]   ;;  %s4306_s3 = inlined_call_operand.vmem [shape: f32[2,14,28], index: 3, kind: input, shape index: {}]   ;;  %s4307_s4 = inlined_call_operand.vmem [shape: f32[2,168,84], index: 4, kind: input, shape index: {}]   ;;  %s4308_s5 = inlined_call_operand.vmem [shape: f32[5,84,160], index: 5, kind: input, shape index: {}]   ;;  %s4309_s6 = inlined_call_operand.vmem [shape: f32[1,160], index: 6, kind: input, shape index: {}]   ;;  %s4310_s7 = inlined_call_operand.vmem [shape: f32[2,5,10], index: 7, kind: input, shape index: {}]   ;;  %s4311_s8 = inlined_call_operand.vmem [shape: f32[2,160,80], index: 8, kind: input, shape index: {}]   ;;  %s4312_s9 = inlined_call_operand.vmem [shape: f32[5,80,120], index: 9, kind: input, shape index: {}]   ;;  %s4313_s10 = inlined_call_operand.vmem [shape: f32[1,120], index: 10, kind: input, shape index: {}]   ;;  %s4314_s11 = inlined_call_operand.vmem [shape: f32[120,84], index: 11, kind: input, shape index: {}]   ;;  %s4315_s12 = inlined_call_operand.vmem [shape: f32[1,84], index: 12, kind: input, shape index: {}]   ;;  %s4316_s13 = inlined_call_operand.vmem [shape: f32[84,10], index: 13, kind: input, shape index: {}]   ;;  %s4317_s14 = inlined_call_operand.vmem [shape: f32[1,10], index: 14, kind: input, shape index: {}]   ;;  %s4318_s15 = inlined_call_operand.hbm [shape: f32[2,1,10], index: 15, kind: output, shape index: {}]  }
   0x1   :  { %4325 = sst [smem:[#allocation11_spill]] %s4303_s0 }
   0x2   :  { %20 = vsyncpa [#allocation3], 0 }
   0x3   :  { %22 = vsyncpa [#allocation3 + $0x1], 0  ;;  %s2846_s18 = smov 0   ;;  %s2848_s19 = smov 0  }
   0x4   :  { %s2850_s20 = smov 0   ;;  %s2852_s21 = smov 0  }
   0x5 LB: > { %4326 = sst [smem:[#allocation5_spill]] %s2752_s18  ;;  %s2867_s22 = sadd.s32 4294967295, %s2764_s21   ;;  %s2764_s21 = sphi %s2852_s21, %s4338_s21   ;;  %s2760_s20 = sphi %s2850_s20, %s4340_s20   ;;  %s2756_s19 = sphi %s2848_s19, %s4342_s19   ;;  %s2752_s18 = sphi %s2846_s18, %s4341_s18  }
   0x6   : > { %4327 = sst [smem:[#allocation6_spill]] %s2760_s20  ;;  %s2282_s23 = sadd.s32 4294967294, %s2764_s21  }
   0x7   : > { %4328 = sst [smem:[#allocation7_spill]] %s2764_s21  ;;  %s2871_s24 = sadd.s32 1, %s2764_s21  }
   0x8   : > { %4329 = sst [smem:[#allocation8_spill]] %s2871_s24  ;;  %s355_s25 = sadd.s32 1, %s2760_s20 }
   0x9   : > { %s352_s26 = ssub.s32 %s2764_s21, %s2871_s24  ;;  %p365_p0 = scmp.ne.s32.totalorder %s2760_s20, %s2756_s19 }
   0xa   : > { %p353_p1 = scmp.eq.s32.totalorder %s352_s26, 0  ;;  %p366_p2 = scmp.eq.s32.totalorder %s2867_s22, 1 }
   0xb   : > { %p371_p3 = scmp.ne.s32.totalorder %s2756_s19, %s2752_s18  ;;  %p372_p4 = scmp.eq.s32.totalorder %s2282_s23, 1 }
   0xc   : > { %s2882_s27 = scalar_select %p353_p1, %s2760_s20, %s355_s25  }
   0xd   : > { %p2884_p5 = por %p366_p2, %p365_p0  ;;  %p2888_p6 = por %p372_p4, %p371_p3 }
   0xe   : > { %4330 = sst [smem:[#allocation9_spill]] %s2882_s27  ;;  %p2285_p7 = scmp.ge.s32.totalorder %s2764_s21, 1 }
   0xf   : > { %s4332_s29 = scalar_select %p2888_p6, 1, 0 }
  0x10   : > { %p440_p8 = scmp.lt.s32.totalorder %s2764_s21, 3 }
  0x11   : > { %4333 = sst [smem:[#allocation10_spill]] %s4332_s29 }
  0x12   : > { %p441_p9 = pnand %p2285_p7, %p440_p8 }
  0x13   : > { %p487_p10 = scmp.lt.s32.totalorder (!%p441_p9), %s2867_s22, 1  ;;  %s4334_s0 = sld [smem:[#allocation11_spill]] (!%p441_p9) }
  0x14   : > { %444 = sbr.rel (%p441_p9) target bundleno = 1458 (0x5b2), region = 80  ;;  %s485_s17 = sand.u32 (!%p441_p9), 1, %s2756_s19  }
  0x15   : > { %s2223_s25 = scalar_lea.hbm (!%p441_p9), %s4318_s15, %s2867_s22  ;;  %s486_s27 = scalar_lea.vmem (!%p441_p9), [#allocation2], %s485_s17 }
  0x16   : > { %s2225_s24 = sshll.u32 (!%p441_p9), %s486_s27, 4  ;;  %s2227_s29 = sshll.u32 (!%p441_p9), %s2223_s25, 4  ;;  %s2226_s24 = int_to_ptr.vmem [resolvable:$true] %s2225_s24  ;;  %s2228_s29 = int_to_ptr.hbm [resolvable:$true] %s2227_s29 }
  0x17   : > { %s2215_s30 = scalar_lea.sflag (!%p441_p9), [#allocation3], %s485_s17  ;;  %s2716_s16 = sshra.s32 (!%p441_p9), %s2228_s29, 4  ;;  %s2717_s16 = int_to_ptr.hbm [resolvable:$true] %s2716_s16 }
  0x18   : > { %p2723_p0 = scmp.lt.s32.totalorder (!%p441_p9), %s2717_s16, %s4318_s15 }
  0x19   : > { %v2310_v0 = vld [vmem:[%s4304_s1 + $0x170] sm:$0xff]  ;;  %v2311_v1 = vld [vmem:[%s4304_s1 + $0x178] sm:$0xff]  ;;  %v2308_v4 = vld [vmem:[%s4304_s1 + $0x160] sm:$0xff]  ;;  %s2952_s20 = scalar_select %p487_p10, %s2867_s22, 1  ;;  %vm549_vm0 = vcmask 1046528   ;;  %vm557_vm1 = vcmask 785408  }
  0x1a   : > { %v518_v2 = vld [vmem:[%s4304_s1 + $0xb0] sm:$0xff]  ;;  %570 = vmatpush.msra.mxu0 %v2310_v0  ;;  %599 = vmatpush.msra.mxu1 %v2311_v1  ;;  %v519_v3 = vld [vmem:[%s4304_s1 + $0xb8] sm:$0xff]  ;;  %v2309_v5 = vld [vmem:[%s4304_s1 + $0x168] sm:$0xff]  ;;  %vm715_vm2 = vcmask 1045504   ;;  %vm822_vm3 = vcmask 1044480   ;;  %vm929_vm4 = vcmask 1043456  }
  0x1b   : > { %636 = vmatpush.msra.mxu2 %v518_v2  ;;  %665 = vmatpush.msra.mxu3 %v519_v3  ;;  %v516_v6 = vld [vmem:[%s4304_s1 + $0xa0] sm:$0xff]  ;;  %v517_v7 = vld [vmem:[%s4304_s1 + $0xa8] sm:$0xff]  ;;  %v2306_v8 = vld [vmem:[%s4304_s1 + $0x150] sm:$0xff]  ;;  %s2662_s23 = sshll.u32 %s2952_s20, 5  ;;  %vm1035_vm5 = vcmask 228352   ;;  %vm1174_vm6 = vcmask 326656  }
  0x1c   : > { %571 = vmatpush.msra.mxu0 %v2308_v4  ;;  %600 = vmatpush.msra.mxu1 %v2309_v5  ;;  %v2307_v9 = vld [vmem:[%s4304_s1 + $0x158] sm:$0xff]  ;;  %v514_v10 = vld [vmem:[%s4304_s1 + $0x90] sm:$0xff]  ;;  %v2304_v12 = vld [vmem:[%s4304_s1 + $0x140] sm:$0xff]  ;;  %s3000_s21 = scalar_lea.vmem %s4334_s0, %s2662_s23  ;;  %vm1347_vm7 = vcmask 687104   ;;  %vm1737_vm8 = vcmask 1041408   ;;  %vm1733_vm9 = vcmask 80896  }
  0x1d   : > { %v515_v11 = vld [vmem:[%s4304_s1 + $0x98] sm:$0xff]  ;;  %637 = vmatpush.msra.mxu2 %v516_v6  ;;  %666 = vmatpush.msra.mxu3 %v517_v7  ;;  %v2305_v13 = vld [vmem:[%s4304_s1 + $0x148] sm:$0xff]  ;;  %v512_v14 = vld [vmem:[%s4304_s1 + $0x80] sm:$0xff]  ;;  %vm1851_vm10 = vcmask 261120   ;;  %vm1980_vm11 = vcmask 654336   ;;  %vm2149_vm12 = vcmask 982016  }
  0x1e   : > { %572 = vmatpush.msra.mxu0 %v2306_v8  ;;  %601 = vmatpush.msra.mxu1 %v2307_v9  ;;  %v513_v15 = vld [vmem:[%s4304_s1 + $0x88] sm:$0xff]  ;;  %v2302_v16 = vld [vmem:[%s4304_s1 + $0x130] sm:$0xff]  ;;  %v2303_v17 = vld [vmem:[%s4304_s1 + $0x138] sm:$0xff]  ;;  %vm2212_vm13 = vcmask 73728   ;;  %s2718_s20 = scalar_lea.hbm %s2717_s16, 1 }
  0x1f   : > { %638 = vmatpush.msra.mxu2 %v514_v10  ;;  %667 = vmatpush.msra.mxu3 %v515_v11  ;;  %v510_v18 = vld [vmem:[%s4304_s1 + $0x70] sm:$0xff]  ;;  %v511_v19 = vld [vmem:[%s4304_s1 + $0x78] sm:$0xff]  ;;  %v2300_v20 = vld [vmem:[%s4304_s1 + $0x120] sm:$0xff]  ;;  %p2719_p11 = scmp.ne.s32.totalorder %s2717_s16, %s2718_s20 }
  0x20   : > { %573 = vmatpush.msra.mxu0 %v2304_v12  ;;  %602 = vmatpush.msra.mxu1 %v2305_v13  ;;  %v2301_v21 = vld [vmem:[%s4304_s1 + $0x128] sm:$0xff]  ;;  %v508_v22 = vld [vmem:[%s4304_s1 + $0x60] sm:$0xff]  ;;  %v2298_v24 = vld [vmem:[%s4304_s1 + $0x110] sm:$0xff] }
  0x21   : > { %639 = vmatpush.msra.mxu2 %v512_v14  ;;  %668 = vmatpush.msra.mxu3 %v513_v15  ;;  %v509_v23 = vld [vmem:[%s4304_s1 + $0x68] sm:$0xff]  ;;  %v2299_v25 = vld [vmem:[%s4304_s1 + $0x118] sm:$0xff]  ;;  %v506_v26 = vld [vmem:[%s4304_s1 + $0x50] sm:$0xff]  ;;  %p2720_p12 = pnand %p2719_p11, %p2884_p5 }
  0x22   : > { %574 = vmatpush.msra.mxu0 %v2302_v16  ;;  %603 = vmatpush.msra.mxu1 %v2303_v17  ;;  %v507_v27 = vld [vmem:[%s4304_s1 + $0x58] sm:$0xff]  ;;  %v2296_v28 = vld [vmem:[%s4304_s1 + $0x100] sm:$0xff]  ;;  %v2297_v29 = vld [vmem:[%s4304_s1 + $0x108] sm:$0xff] }
  0x23   : > { %640 = vmatpush.msra.mxu2 %v510_v18  ;;  %669 = vmatpush.msra.mxu3 %v511_v19  ;;  %v504_v30 = vld [vmem:[%s4304_s1 + $0x40] sm:$0xff]  ;;  %v505_v31 = vld [vmem:[%s4304_s1 + $0x48] sm:$0xff]  ;;  %v2294_v32 = vld [vmem:[%s4304_s1 + $0xf0] sm:$0xff]  ;;  %p2721_p13 = pneg %p2720_p12 }
  0x24   : > { %575 = vmatpush.msra.mxu0 %v2300_v20  ;;  %604 = vmatpush.msra.mxu1 %v2301_v21  ;;  %v2295_v33 = vld [vmem:[%s4304_s1 + $0xf8] sm:$0xff]  ;;  %v502_v34 = vld [vmem:[%s4304_s1 + $0x30] sm:$0xff]  ;;  %v2292_v36 = vld [vmem:[%s4304_s1 + $0xe0] sm:$0xff] }
  0x25   : > { %641 = vmatpush.msra.mxu2 %v508_v22  ;;  %670 = vmatpush.msra.mxu3 %v509_v23  ;;  %v503_v35 = vld [vmem:[%s4304_s1 + $0x38] sm:$0xff]  ;;  %v2293_v37 = vld [vmem:[%s4304_s1 + $0xe8] sm:$0xff]  ;;  %v3021_v38 = vld [vmem:[%s3000_s21] sm:$0xff] }
  0x26   : > { %576 = vmatpush.msra.mxu0 %v2298_v24  ;;  %605 = vmatpush.msra.mxu1 %v2299_v25  ;;  %v3024_v39 = vld [vmem:[%s3000_s21 + $0x8] sm:$0xff]  ;;  %v500_v40 = vld [vmem:[%s4304_s1 + $0x20] sm:$0xff]  ;;  %v2290_v42 = vld [vmem:[%s4304_s1 + $0xd0] sm:$0xff]  ;;  %v550_v44 = vrot.slane %v3021_v38, 1 }
  0x27   : > { %642 = vmatpush.msra.mxu2 %v506_v26  ;;  %671 = vmatpush.msra.mxu3 %v507_v27  ;;  %v501_v41 = vld [vmem:[%s4304_s1 + $0x28] sm:$0xff]  ;;  %v2291_v43 = vld [vmem:[%s4304_s1 + $0xd8] sm:$0xff]  ;;  %v551_v45 = vrot.slane %v3024_v39, 1  ;;  %v498_v46 = vld [vmem:[%s4304_s1 + $0x10] sm:$0xff] }
  0x28   : > { %577 = vmatpush.msra.mxu0 %v2296_v28  ;;  %606 = vmatpush.msra.mxu1 %v2297_v29  ;;  %v499_v47 = vld [vmem:[%s4304_s1 + $0x18] sm:$0xff]  ;;  %v2288_v48 = vld [vmem:[%s4304_s1 + $0xc0] sm:$0xff]  ;;  %v2289_v49 = vld [vmem:[%s4304_s1 + $0xc8] sm:$0xff] }
  0x29   : > { %643 = vmatpush.msra.mxu2 %v504_v30  ;;  %672 = vmatpush.msra.mxu3 %v505_v31  ;;  %v496_v50 = vld [vmem:[%s4304_s1] sm:$0xff]  ;;  %v497_v51 = vld [vmem:[%s4304_s1 + $0x8] sm:$0xff]  ;;  %v552_v52 = vsel %vm549_vm0, %v550_v44, %v551_v45  ;;  %v3060_v53 = vld [vmem:[%s3000_s21 + $0x10] sm:$0xff]  ;;  %v824_v44 = vrot.slane %v3024_v39, 3 }
  0x2a   : > { %578 = vmatpush.msra.mxu0 %v2294_v32  ;;  %607 = vmatpush.msra.mxu1 %v2295_v33  ;;  %v2350_v54 = vld [vmem:[%s4304_s1 + $0x230] sm:$0xff]  ;;  %v2351_v55 = vld [vmem:[%s4304_s1 + $0x238] sm:$0xff]  ;;  %v553_v58 = vrot.slane %v3060_v53, 1  ;;  %v2348_v59 = vld [vmem:[%s4304_s1 + $0x220] sm:$0xff] }
  0x2b   : > { %644 = vmatpush.msra.mxu2 %v502_v34  ;;  %673 = vmatpush.msra.mxu3 %v503_v35  ;;  %v2382_v56 = vld [vmem:[%s4304_s1 + $0x2f0] sm:$0xff]  ;;  %v2383_v57 = vld [vmem:[%s4304_s1 + $0x2f8] sm:$0xff]  ;;  %v2349_v60 = vld [vmem:[%s4304_s1 + $0x228] sm:$0xff] }
  0x2c   : > { %579 = vmatpush.msra.mxu0 %v2292_v36  ;;  %608 = vmatpush.msra.mxu1 %v2293_v37  ;;  %v2380_v61 = vld [vmem:[%s4304_s1 + $0x2e0] sm:$0xff]  ;;  %v2381_v62 = vld [vmem:[%s4304_s1 + $0x2e8] sm:$0xff]  ;;  %v2346_v63 = vld [vmem:[%s4304_s1 + $0x210] sm:$0xff]  ;;  %v554_v3 = vsel %vm549_vm0, %v551_v45, %v553_v58  ;;  %v716_v37 = vrot.slane %v3021_v38, 2 }
  0x2d   : > { %645 = vmatpush.msra.mxu2 %v500_v40  ;;  %674 = vmatpush.msra.mxu3 %v501_v41  ;;  %v2347_v0 = vld [vmem:[%s4304_s1 + $0x218] sm:$0xff]  ;;  %v2378_v1 = vld [vmem:[%s4304_s1 + $0x2d0] sm:$0xff]  ;;  %v2344_v5 = vld [vmem:[%s4304_s1 + $0x200] sm:$0xff]  ;;  %v717_v40 = vrot.slane %v3024_v39, 2 }
  0x2e   : > { %580 = vmatpush.msra.mxu0 %v2290_v42  ;;  %609 = vmatpush.msra.mxu1 %v2291_v43  ;;  %v2379_v2 = vld [vmem:[%s4304_s1 + $0x2d8] sm:$0xff]  ;;  %v2345_v6 = vld [vmem:[%s4304_s1 + $0x208] sm:$0xff]  ;;  %v2376_v7 = vld [vmem:[%s4304_s1 + $0x2c0] sm:$0xff]  ;;  %v823_v43 = vrot.slane %v3021_v38, 3 }
  0x2f   : > { %646 = vmatpush.msra.mxu2 %v498_v46  ;;  %675 = vmatpush.msra.mxu3 %v499_v47  ;;  %v3107_v4 = vld [vmem:[%s3000_s21 + $0x18] sm:$0xff]  ;;  %v2377_v8 = vld [vmem:[%s4304_s1 + $0x2c8] sm:$0xff]  ;;  %v2342_v10 = vld [vmem:[%s4304_s1 + $0x1f0] sm:$0xff]  ;;  %s2722_s21 = scalar_lea.hbm %s4318_s15, 2 }
  0x30   : > { %581 = vmatpush.msra.mxu0 %v2288_v48  ;;  %610 = vmatpush.msra.mxu1 %v2289_v49  ;;  %v555_v9 = vrot.slane %v3107_v4, 1  ;;  %v2343_v11 = vld [vmem:[%s4304_s1 + $0x1f8] sm:$0xff]  ;;  %v2374_v12 = vld [vmem:[%s4304_s1 + $0x2b0] sm:$0xff]  ;;  %v2340_v14 = vld [vmem:[%s4304_s1 + $0x1e0] sm:$0xff]  ;;  %v718_v49 = vsel %vm715_vm2, %v716_v37, %v717_v40  ;;  %p2724_p1 = scmp.lt.s32.totalorder %s2722_s21, %s2718_s20 }
  0x31   : > { %647 = vmatpush.msra.mxu2 %v496_v50  ;;  %676 = vmatpush.msra.mxu3 %v497_v51  ;;  %v2375_v13 = vld [vmem:[%s4304_s1 + $0x2b8] sm:$0xff]  ;;  %v2341_v15 = vld [vmem:[%s4304_s1 + $0x1e8] sm:$0xff]  ;;  %v2372_v16 = vld [vmem:[%s4304_s1 + $0x2a0] sm:$0xff]  ;;  %v825_v50 = vsel %vm822_vm3, %v823_v43, %v824_v44  ;;  %v930_v51 = vrot.slane %v3021_v38, 4 }
  0x32   : > { %2312 = vmatmul.msk.f32.vlgmr.msra.gmra.mxu0 %vm557_vm1, %v552_v52  ;;  %2316 = vmatmul.msk.f32.vlgmr.msra.gmra.mxu1 %vm557_vm1, %v552_v52  ;;  %v2373_v17 = vld [vmem:[%s4304_s1 + $0x2a8] sm:$0xff]  ;;  %v556_v18 = vsel %vm549_vm0, %v553_v58, %v555_v9  ;;  %v2338_v19 = vld [vmem:[%s4304_s1 + $0x1d0] sm:$0xff]  ;;  %v2339_v20 = vld [vmem:[%s4304_s1 + $0x1d8] sm:$0xff]  ;;  %v931_v52 = vrot.slane %v3024_v39, 4  ;;  %p2725_p2 = por %p2724_p1, %p2723_p0 }
  0x33   : > { %2320 = vmatmul.msk.f32.vlgmr.msra.gmra.mxu2 %vm557_vm1, %v3021_v38  ;;  %2324 = vmatmul.msk.f32.vlgmr.msra.gmra.mxu3 %vm557_vm1, %v3021_v38  ;;  %v2370_v21 = vld [vmem:[%s4304_s1 + $0x290] sm:$0xff]  ;;  %v2371_v22 = vld [vmem:[%s4304_s1 + $0x298] sm:$0xff]  ;;  %v2336_v23 = vld [vmem:[%s4304_s1 + $0x1c0] sm:$0xff]  ;;  %v933_v38 = vrot.slane %v3060_v53, 4 }
  0x34   : > { %735 = vmatpush.msrb.mxu0 %v2350_v54  ;;  %764 = vmatpush.msrb.mxu1 %v2351_v55  ;;  %v2337_v24 = vld [vmem:[%s4304_s1 + $0x1c8] sm:$0xff]  ;;  %v2368_v25 = vld [vmem:[%s4304_s1 + $0x280] sm:$0xff]  ;;  %v2334_v27 = vld [vmem:[%s4304_s1 + $0x1b0] sm:$0xff]  ;;  %p2726_p3 = pnand %p2725_p2, %p2721_p13 }
  0x35   : > { %842 = vmatpush.msrb.mxu2 %v2382_v56  ;;  %871 = vmatpush.msrb.mxu3 %v2383_v57  ;;  %v2369_v26 = vld [vmem:[%s4304_s1 + $0x288] sm:$0xff]  ;;  %v2335_v28 = vld [vmem:[%s4304_s1 + $0x1b8] sm:$0xff]  ;;  %v2366_v29 = vld [vmem:[%s4304_s1 + $0x270] sm:$0xff]  ;;  %v3254_v56 = vsel %vm929_vm4, %v930_v51, %v931_v52 }
  0x36   : > { %736 = vmatpush.msrb.mxu0 %v2348_v59  ;;  %765 = vmatpush.msrb.mxu1 %v2349_v60  ;;  %v2367_v30 = vld [vmem:[%s4304_s1 + $0x278] sm:$0xff]  ;;  %v2332_v31 = vld [vmem:[%s4304_s1 + $0x1a0] sm:$0xff]  ;;  %v2333_v32 = vld [vmem:[%s4304_s1 + $0x1a8] sm:$0xff]  ;;  %v826_v59 = vrot.slane %v3060_v53, 3  ;;  %v3268_v60 = vsel %vm929_vm4, %v931_v52, %v933_v38 }
  0x37   : > { %843 = vmatpush.msrb.mxu2 %v2380_v61  ;;  %872 = vmatpush.msrb.mxu3 %v2381_v62  ;;  %v2364_v33 = vld [vmem:[%s4304_s1 + $0x260] sm:$0xff]  ;;  %v2365_v34 = vld [vmem:[%s4304_s1 + $0x268] sm:$0xff]  ;;  %v2330_v35 = vld [vmem:[%s4304_s1 + $0x190] sm:$0xff] }
  0x38   : > { %737 = vmatpush.msrb.mxu0 %v2346_v63  ;;  %766 = vmatpush.msrb.mxu1 %v2347_v0  ;;  %v2331_v36 = vld [vmem:[%s4304_s1 + $0x198] sm:$0xff]  ;;  %v2362_v41 = vld [vmem:[%s4304_s1 + $0x250] sm:$0xff]  ;;  %v2328_v45 = vld [vmem:[%s4304_s1 + $0x180] sm:$0xff]  ;;  %v827_v0 = vsel %vm822_vm3, %v824_v44, %v826_v59 }
  0x39   : > { %844 = vmatpush.msrb.mxu2 %v2378_v1  ;;  %873 = vmatpush.msrb.mxu3 %v2379_v2  ;;  %v2363_v42 = vld [vmem:[%s4304_s1 + $0x258] sm:$0xff]  ;;  %v2329_v46 = vld [vmem:[%s4304_s1 + $0x188] sm:$0xff]  ;;  %v2360_v47 = vld [vmem:[%s4304_s1 + $0x240] sm:$0xff]  ;;  %v935_v2 = vrot.slane %v3107_v4, 4 }
  0x3a   : > { %2313 = vmatmul.msk.f32.gmra.mxu0 %vm557_vm1, %v554_v3  ;;  %2317 = vmatmul.msk.f32.gmra.mxu1 %vm557_vm1, %v554_v3  ;;  %v2361_v48 = vld [vmem:[%s4304_s1 + $0x248] sm:$0xff]  ;;  %v2414_v54 = vld [vmem:[%s4304_s1 + $0x3b0] sm:$0xff]  ;;  %v2415_v55 = vld [vmem:[%s4304_s1 + $0x3b8] sm:$0xff]  ;;  %v721_v3 = vrot.slane %v3107_v4, 2 }
  0x3b   : > { %2321 = vmatmul.msk.f32.gmra.mxu2 %vm557_vm1, %v3024_v39  ;;  %2325 = vmatmul.msk.f32.gmra.mxu3 %vm557_vm1, %v3024_v39  ;;  %v719_v39 = vrot.slane %v3060_v53, 2  ;;  %v2412_v57 = vld [vmem:[%s4304_s1 + $0x3a0] sm:$0xff]  ;;  %v2413_v58 = vld [vmem:[%s4304_s1 + $0x3a8] sm:$0xff]  ;;  %v2410_v61 = vld [vmem:[%s4304_s1 + $0x390] sm:$0xff] }
  0x3c   : > { %738 = vmatpush.msrb.mxu0 %v2344_v5  ;;  %767 = vmatpush.msrb.mxu1 %v2345_v6  ;;  %v2411_v62 = vld [vmem:[%s4304_s1 + $0x398] sm:$0xff]  ;;  %v2409_v1 = vld [vmem:[%s4304_s1 + $0x388] sm:$0xff]  ;;  %v2406_v5 = vld [vmem:[%s4304_s1 + $0x370] sm:$0xff] }
  0x3d   : > { %845 = vmatpush.msrb.mxu2 %v2376_v7  ;;  %874 = vmatpush.msrb.mxu3 %v2377_v8  ;;  %v720_v63 = vsel %vm715_vm2, %v717_v40, %v719_v39  ;;  %v2407_v6 = vld [vmem:[%s4304_s1 + $0x378] sm:$0xff]  ;;  %v828_v7 = vrot.slane %v3107_v4, 3  ;;  %v936_v8 = vsel %vm929_vm4, %v933_v38, %v935_v2 }
  0x3e   : > { %739 = vmatpush.msrb.mxu0 %v2342_v10  ;;  %768 = vmatpush.msrb.mxu1 %v2343_v11  ;;  %v2405_v10 = vld [vmem:[%s4304_s1 + $0x368] sm:$0xff]  ;;  %v722_v11 = vsel %vm715_vm2, %v719_v39, %v721_v3 }
  0x3f   : > { %846 = vmatpush.msrb.mxu2 %v2374_v12  ;;  %875 = vmatpush.msrb.mxu3 %v2375_v13  ;;  %v829_v12 = vsel %vm822_vm3, %v826_v59, %v828_v7  ;;  %v2403_v13 = vld [vmem:[%s4304_s1 + $0x358] sm:$0xff] }
  0x40   : > { %740 = vmatpush.msrb.mxu0 %v2340_v14  ;;  %769 = vmatpush.msrb.mxu1 %v2341_v15  ;;  %v2400_v14 = vld [vmem:[%s4304_s1 + $0x340] sm:$0xff]  ;;  %v2401_v15 = vld [vmem:[%s4304_s1 + $0x348] sm:$0xff] }
  0x41   : > { %847 = vmatpush.msrb.mxu2 %v2372_v16  ;;  %876 = vmatpush.msrb.mxu3 %v2373_v17  ;;  %v2398_v16 = vld [vmem:[%s4304_s1 + $0x330] sm:$0xff]  ;;  %v2399_v17 = vld [vmem:[%s4304_s1 + $0x338] sm:$0xff] }
  0x42   : > { %2314 = vmatmul.msk.f32.gmra.mxu0 %vm557_vm1, %v556_v18  ;;  %2318 = vmatmul.msk.f32.gmra.mxu1 %vm557_vm1, %v556_v18  ;;  %v2396_v18 = vld [vmem:[%s4304_s1 + $0x320] sm:$0xff] }
  0x43   : > { %2322 = vmatmul.msk.f32.gmra.mxu2 %vm557_vm1, %v3060_v53  ;;  %2326 = vmatmul.msk.f32.gmra.mxu3 %vm557_vm1, %v3060_v53  ;;  %v2408_v53 = vld [vmem:[%s4304_s1 + $0x380] sm:$0xff] }
  0x44   : > { %741 = vmatpush.msrb.mxu0 %v2338_v19  ;;  %770 = vmatpush.msrb.mxu1 %v2339_v20  ;;  %v2397_v19 = vld [vmem:[%s4304_s1 + $0x328] sm:$0xff]  ;;  %v2394_v20 = vld [vmem:[%s4304_s1 + $0x310] sm:$0xff] }
  0x45   : > { %848 = vmatpush.msrb.mxu2 %v2370_v21  ;;  %877 = vmatpush.msrb.mxu3 %v2371_v22  ;;  %v2395_v21 = vld [vmem:[%s4304_s1 + $0x318] sm:$0xff]  ;;  %v2392_v22 = vld [vmem:[%s4304_s1 + $0x300] sm:$0xff] }
  0x46   : > { %742 = vmatpush.msrb.mxu0 %v2336_v23  ;;  %771 = vmatpush.msrb.mxu1 %v2337_v24  ;;  %v2393_v23 = vld [vmem:[%s4304_s1 + $0x308] sm:$0xff] }
  0x47   : > { %849 = vmatpush.msrb.mxu2 %v2368_v25  ;;  %878 = vmatpush.msrb.mxu3 %v2369_v26 }
  0x48   : > { %743 = vmatpush.msrb.mxu0 %v2334_v27  ;;  %772 = vmatpush.msrb.mxu1 %v2335_v28 }
  0x49   : > { %850 = vmatpush.msrb.mxu2 %v2366_v29  ;;  %879 = vmatpush.msrb.mxu3 %v2367_v30 }
  0x4a   : > { %2315 = vmatmul.msk.f32.gmra.mxu0 %vm557_vm1, %v555_v9  ;;  %2319 = vmatmul.msk.f32.gmra.mxu1 %vm557_vm1, %v555_v9  ;;  %v2404_v9 = vld [vmem:[%s4304_s1 + $0x360] sm:$0xff] }
  0x4b   : > { %2323 = vmatmul.msk.f32.gmra.mxu2 %vm557_vm1, %v3107_v4  ;;  %2327 = vmatmul.msk.f32.gmra.mxu3 %vm557_vm1, %v3107_v4  ;;  %v2402_v4 = vld [vmem:[%s4304_s1 + $0x350] sm:$0xff] }
  0x4c   : > { %744 = vmatpush.msrb.mxu0 %v2332_v31  ;;  %773 = vmatpush.msrb.mxu1 %v2333_v32 }
  0x4d   : > { %851 = vmatpush.msrb.mxu2 %v2364_v33  ;;  %880 = vmatpush.msrb.mxu3 %v2365_v34 }
  0x4e   : > { %745 = vmatpush.msrb.mxu0 %v2330_v35  ;;  %774 = vmatpush.msrb.mxu1 %v2331_v36 }
  0x4f   : > { %852 = vmatpush.msrb.mxu2 %v2362_v41  ;;  %881 = vmatpush.msrb.mxu3 %v2363_v42 }
  0x50   : > { %746 = vmatpush.msrb.mxu0 %v2328_v45  ;;  %775 = vmatpush.msrb.mxu1 %v2329_v46 }
  0x51   : > { %853 = vmatpush.msrb.mxu2 %v2360_v47  ;;  %882 = vmatpush.msrb.mxu3 %v2361_v48 }
  0x52   : > { %2352 = vmatmul.msk.f32.vlgmr.msrb.gmra.mxu0 %vm557_vm1, %v718_v49  ;;  %2356 = vmatmul.msk.f32.vlgmr.msrb.gmra.mxu1 %vm557_vm1, %v718_v49 }
  0x53   : > { %2384 = vmatmul.msk.f32.vlgmr.msrb.gmra.mxu2 %vm557_vm1, %v825_v50  ;;  %2388 = vmatmul.msk.f32.vlgmr.msrb.gmra.mxu3 %vm557_vm1, %v825_v50 }
  0x54   : > { %949 = vmatpush.msra.mxu0 %v2414_v54  ;;  %978 = vmatpush.msra.mxu1 %v2415_v55 }
  0x56   : > { %950 = vmatpush.msra.mxu0 %v2412_v57  ;;  %979 = vmatpush.msra.mxu1 %v2413_v58 }
  0x58   : > { %951 = vmatpush.msra.mxu0 %v2410_v61  ;;  %980 = vmatpush.msra.mxu1 %v2411_v62 }
  0x5a   : > { %2353 = vmatmul.msk.f32.gmra.mxu0 %vm557_vm1, %v720_v63  ;;  %2357 = vmatmul.msk.f32.gmra.mxu1 %vm557_vm1, %v720_v63 }
  0x5b   : > { %2385 = vmatmul.msk.f32.gmra.mxu2 %vm557_vm1, %v827_v0  ;;  %2389 = vmatmul.msk.f32.gmra.mxu3 %vm557_vm1, %v827_v0 }
  0x5c   : > { %952 = vmatpush.msra.mxu0 %v2408_v53  ;;  %981 = vmatpush.msra.mxu1 %v2409_v1 }
  0x5e   : > { %953 = vmatpush.msra.mxu0 %v2406_v5  ;;  %982 = vmatpush.msra.mxu1 %v2407_v6 }
  0x60   : > { %954 = vmatpush.msra.mxu0 %v2404_v9  ;;  %983 = vmatpush.msra.mxu1 %v2405_v10 }
  0x62   : > { %2354 = vmatmul.msk.f32.gmra.mxu0 %vm557_vm1, %v722_v11  ;;  %2358 = vmatmul.msk.f32.gmra.mxu1 %vm557_vm1, %v722_v11 }
  0x63   : > { %2386 = vmatmul.msk.f32.gmra.mxu2 %vm557_vm1, %v829_v12  ;;  %2390 = vmatmul.msk.f32.gmra.mxu3 %vm557_vm1, %v829_v12 }
  0x64   : > { %955 = vmatpush.msra.mxu0 %v2402_v4  ;;  %984 = vmatpush.msra.mxu1 %v2403_v13 }
  0x66   : > { %956 = vmatpush.msra.mxu0 %v2400_v14  ;;  %985 = vmatpush.msra.mxu1 %v2401_v15  ;;  %v1011_v14 = vld [vmem:[%s4305_s2] sm:$0x3] }
  0x68   : > { %957 = vmatpush.msra.mxu0 %v2398_v16  ;;  %986 = vmatpush.msra.mxu1 %v2399_v17 }
  0x6a   : > { %2355 = vmatmul.msk.f32.gmra.mxu0 %vm557_vm1, %v721_v3  ;;  %2359 = vmatmul.msk.f32.gmra.mxu1 %vm557_vm1, %v721_v3 }
  0x6b   : > { %2387 = vmatmul.msk.f32.gmra.mxu2 %vm557_vm1, %v828_v7  ;;  %2391 = vmatmul.msk.f32.gmra.mxu3 %vm557_vm1, %v828_v7 }
  0x6c   : > { %958 = vmatpush.msra.mxu0 %v2396_v18  ;;  %987 = vmatpush.msra.mxu1 %v2397_v19 }
  0x6e   : > { %959 = vmatpush.msra.mxu0 %v2394_v20  ;;  %988 = vmatpush.msra.mxu1 %v2395_v21 }
  0x70   : > { %960 = vmatpush.msra.mxu0 %v2392_v22  ;;  %989 = vmatpush.msra.mxu1 %v2393_v23 }
  0x72   : > { %2416 = vmatmul.msk.f32.vlgmr.msra.gmra.mxu0 %vm557_vm1, %v3254_v56  ;;  %2420 = vmatmul.msk.f32.vlgmr.msra.gmra.mxu1 %vm557_vm1, %v3254_v56 }
  0x7a   : > { %2417 = vmatmul.msk.f32.gmra.mxu0 %vm557_vm1, %v3268_v60  ;;  %2421 = vmatmul.msk.f32.gmra.mxu1 %vm557_vm1, %v3268_v60 }
  0x82   : > { %2418 = vmatmul.msk.f32.gmra.mxu0 %vm557_vm1, %v936_v8  ;;  %2422 = vmatmul.msk.f32.gmra.mxu1 %vm557_vm1, %v936_v8 }
  0x8a   : > { %2419 = vmatmul.msk.f32.gmra.mxu0 %vm557_vm1, %v935_v2  ;;  %2423 = vmatmul.msk.f32.gmra.mxu1 %vm557_vm1, %v935_v2 }
  0xaf   : > { %v583_v24 = vpop.f32.mrf.mxu0  ;;  %v612_v25 = vpop.f32.mrf.mxu1 }
  0xb6   : > { %v649_v28 = vpop.f32.mrf.mxu2  ;;  %v678_v29 = vpop.f32.mrf.mxu3 }
  0xb7   : > { %v586_v26 = vpop.f32.mrf.mxu0  ;;  %v615_v27 = vpop.f32.mrf.mxu1  ;;  %v650_v5 = vadd.f32 %v649_v28, %v583_v24  ;;  %v679_v6 = vadd.f32 %v678_v29, %v612_v25  ;;  %v1013_v25 = vperm.slane %v1011_v14, 0 }
  0xbe   : > { %v652_v32 = vpop.f32.mrf.mxu2  ;;  %v681_v33 = vpop.f32.mrf.mxu3 }
  0xbf   : > { %v589_v30 = vpop.f32.mrf.mxu0  ;;  %v618_v31 = vpop.f32.mrf.mxu1  ;;  %v653_v63 = vadd.f32 %v652_v32, %v586_v26  ;;  %v682_v0 = vadd.f32 %v681_v33, %v615_v27  ;;  %v1014_v26 = vperm.slane %v1011_v14, 1  ;;  %v2444_v14 = vld [vmem:[%s4307_s4 + $0xc8] sm:$0xff] }
  0xc6   : > { %v655_v40 = vpop.f32.mrf.mxu2  ;;  %v684_v41 = vpop.f32.mrf.mxu3 }
  0xc7   : > { %v592_v34 = vpop.f32.mrf.mxu0  ;;  %v621_v35 = vpop.f32.mrf.mxu1  ;;  %v656_v61 = vadd.f32 %v655_v40, %v589_v30  ;;  %v685_v62 = vadd.f32 %v684_v41, %v618_v31 }
  0xce   : > { %v658_v44 = vpop.f32.mrf.mxu2  ;;  %v687_v45 = vpop.f32.mrf.mxu3 }
  0xcf   : > { %v748_v36 = vpop.f32.mrf.mxu0  ;;  %v777_v37 = vpop.f32.mrf.mxu1  ;;  %v659_v53 = vadd.f32 %v658_v44, %v592_v34  ;;  %v688_v1 = vadd.f32 %v687_v45, %v621_v35  ;;  %v1168_v45 = vld [vmem:[%s4307_s4 + $0x78] sm:$0xff] }
  0xd0   : > { %v789_v15 = vadd.f32 %v748_v36, %v650_v5  ;;  %v790_v16 = vadd.f32 %v777_v37, %v679_v6  ;;  %1181 = vmatpush.msrb.mxu1 %v1168_v45  ;;  %v2449_v5 = vld [vmem:[%s4307_s4 + $0xf0] sm:$0xff]  ;;  %v1161_v6 = vld [vmem:[%s4307_s4 + $0x40] sm:$0xff] }
  0xd6   : > { %v855_v48 = vpop.f32.mrf.mxu2  ;;  %v884_v49 = vpop.f32.mrf.mxu3 }
  0xd7   : > { %v751_v42 = vpop.f32.mrf.mxu0  ;;  %v780_v43 = vpop.f32.mrf.mxu1  ;;  %v896_v23 = vadd.f32 %v855_v48, %v789_v15  ;;  %v897_v24 = vadd.f32 %v884_v49, %v790_v16  ;;  %v2460_v15 = vld [vmem:[%s4307_s4 + $0x148] sm:$0xff]  ;;  %v1156_v16 = vld [vmem:[%s4307_s4 + $0x18] sm:$0xff] }
  0xd8   : > { %v791_v7 = vadd.f32 %v751_v42, %v653_v63  ;;  %v792_v8 = vadd.f32 %v780_v43, %v682_v0  ;;  %v2452_v63 = vld [vmem:[%s4307_s4 + $0x108] sm:$0xff]  ;;  %v2430_v0 = vld [vmem:[%s4306_s3 + $0x10] sm:$0xff] }
  0xde   : > { %v858_v52 = vpop.f32.mrf.mxu2  ;;  %v887_v54 = vpop.f32.mrf.mxu3 }
  0xdf   : > { %v754_v46 = vpop.f32.mrf.mxu0  ;;  %v783_v47 = vpop.f32.mrf.mxu1  ;;  %v898_v17 = vadd.f32 %v858_v52, %v791_v7  ;;  %v899_v18 = vadd.f32 %v887_v54, %v792_v8  ;;  %v1166_v54 = vld [vmem:[%s4307_s4 + $0x68] sm:$0xff]  ;;  %v1160_v8 = vld [vmem:[%s4307_s4 + $0x38] sm:$0xff] }
  0xe0   : > { %v793_v2 = vadd.f32 %v754_v46, %v656_v61  ;;  %v794_v3 = vadd.f32 %v783_v47, %v685_v62  ;;  %v2454_v61 = vld [vmem:[%s4307_s4 + $0x118] sm:$0xff]  ;;  %v2453_v62 = vld [vmem:[%s4307_s4 + $0x110] sm:$0xff]  ;;  %v2448_v7 = vld [vmem:[%s4307_s4 + $0xe8] sm:$0xff] }
  0xe6   : > { %v861_v57 = vpop.f32.mrf.mxu2  ;;  %v890_v58 = vpop.f32.mrf.mxu3 }
  0xe7   : > { %v757_v50 = vpop.f32.mrf.mxu0  ;;  %v786_v51 = vpop.f32.mrf.mxu1  ;;  %v900_v11 = vadd.f32 %v861_v57, %v793_v2  ;;  %v901_v12 = vadd.f32 %v890_v58, %v794_v3  ;;  %v1164_v57 = vld [vmem:[%s4307_s4 + $0x58] sm:$0xff]  ;;  %v1163_v58 = vld [vmem:[%s4307_s4 + $0x50] sm:$0xff]  ;;  %v1162_v3 = vld [vmem:[%s4307_s4 + $0x48] sm:$0xff] }
  0xe8   : > { %v795_v4 = vadd.f32 %v757_v50, %v659_v53  ;;  %v796_v13 = vadd.f32 %v786_v51, %v688_v1  ;;  %v1167_v50 = vld [vmem:[%s4307_s4 + $0x70] sm:$0xff]  ;;  %v2451_v53 = vld [vmem:[%s4307_s4 + $0x100] sm:$0xff]  ;;  %v2450_v1 = vld [vmem:[%s4307_s4 + $0xf8] sm:$0xff] }
  0xe9   : > { %1182 = vmatpush.msrb.mxu1 %v1167_v50  ;;  %v2431_v2 = vld [vmem:[%s4306_s3 + $0x18] sm:$0x3f] }
  0xeb   : > { %1183 = vmatpush.msrb.mxu1 %v1166_v54  ;;  %v2483_v54 = vld [vmem:[%s4308_s5 + $0x150] sm:$0xf] }
  0xec   : > { %2485 = vmatpush.msk.msrb.mxu0 %vm929_vm4, %v2483_v54 }
  0xee   : > { %v864_v9 = vpop.f32.mrf.mxu2  ;;  %v893_v10 = vpop.f32.mrf.mxu3 }
  0xef   : > { %v962_v55 = vpop.f32.mrf.mxu0  ;;  %v991_v56 = vpop.f32.mrf.mxu1  ;;  %v902_v19 = vadd.f32 %v864_v9, %v795_v4  ;;  %v903_v20 = vadd.f32 %v893_v10, %v796_v13  ;;  %v2447_v9 = vld [vmem:[%s4307_s4 + $0xe0] sm:$0xff]  ;;  %v1159_v10 = vld [vmem:[%s4307_s4 + $0x30] sm:$0xff] }
  0xf0   : > { %v1003_v33 = vadd.f32 %v962_v55, %v896_v23  ;;  %v1004_v34 = vadd.f32 %v991_v56, %v897_v24  ;;  %v2445_v4 = vld [vmem:[%s4307_s4 + $0xd0] sm:$0xff]  ;;  %v1157_v13 = vld [vmem:[%s4307_s4 + $0x20] sm:$0xff] }
  0xf1   : > { %v2441_v23 = vld [vmem:[%s4307_s4 + $0xb0] sm:$0xff] }
  0xf2   : > { %v1017_v46 = vadd.f32 %v1013_v25, %v1003_v33  ;;  %v1018_v47 = vadd.f32 %v1014_v26, %v1004_v34  ;;  %v2457_v24 = vld [vmem:[%s4307_s4 + $0x130] sm:$0xff]  ;;  %v1169_v34 = vld [vmem:[%s4307_s4 + $0x80] sm:$0xff] }
  0xf4   : > { %v1025_v55 = vmax.f32 %v1017_v46, 0.0  ;;  %v1026_v56 = vmax.f32 %v1018_v47, 0.0 }
  0xf7   : > { %v965_v38 = vpop.f32.mrf.mxu0  ;;  %v994_v39 = vpop.f32.mrf.mxu1 }
  0xf8   : > { %v1005_v29 = vadd.f32 %v965_v38, %v898_v17  ;;  %v1006_v30 = vadd.f32 %v994_v39, %v899_v18  ;;  %v1033_v38 = vld [vmem:[%s4306_s3] sm:$0xff] }
  0xf9   : > { %v1165_v39 = vld [vmem:[%s4307_s4 + $0x60] sm:$0xff] }
  0xfa   : > { %v1019_v41 = vadd.f32 %v1013_v25, %v1005_v29  ;;  %v1020_v42 = vadd.f32 %v1014_v26, %v1006_v30  ;;  %1184 = vmatpush.msrb.mxu1 %v1165_v39  ;;  %v2443_v17 = vld [vmem:[%s4307_s4 + $0xc0] sm:$0xff]  ;;  %v1172_v29 = vld [vmem:[%s4307_s4 + $0x98] sm:$0xff]  ;;  %v1171_v30 = vld [vmem:[%s4307_s4 + $0x90] sm:$0xff] }
  0xfb   : > { %v2459_v18 = vld [vmem:[%s4307_s4 + $0x140] sm:$0xff] }
  0xfc   : > { %v1027_v51 = vmax.f32 %v1019_v41, 0.0  ;;  %v1028_v52 = vmax.f32 %v1020_v42, 0.0  ;;  %1185 = vmatpush.msrb.mxu1 %v1164_v57  ;;  %v1315_v41 = vld [vmem:[%s4308_s5 + $0x90] sm:$0xff]  ;;  %v1316_v42 = vld [vmem:[%s4308_s5 + $0x98] sm:$0xff]  ;;  %v2481_v39 = vld [vmem:[%s4308_s5 + $0x140] sm:$0xff] }
  0xfd   : > { %v2482_v57 = vld [vmem:[%s4308_s5 + $0x148] sm:$0xff]  ;;  %1364 = vmatpush.msrb.mxu0 %v2481_v39  ;;  %v2530_v39 = vld [vmem:[%s4308_s5 + $0x238] sm:$0xff] }
  0xfe   : > { %1186 = vmatpush.msrb.mxu1 %v1163_v58  ;;  %v1309_v58 = vld [vmem:[%s4308_s5 + $0x60] sm:$0xff] }
  0xff   : > { %v968_v59 = vpop.f32.mrf.mxu0  ;;  %v997_v60 = vpop.f32.mrf.mxu1 }
 0x100   : > { %v1007_v21 = vadd.f32 %v968_v59, %v900_v11  ;;  %v1008_v22 = vadd.f32 %v997_v60, %v901_v12  ;;  %v1034_v59 = vld [vmem:[%s4306_s3 + $0x8] sm:$0x3f]  ;;  %v2455_v60 = vld [vmem:[%s4307_s4 + $0x120] sm:$0xff]  ;;  %1187 = vmatpush.msrb.mxu1 %v1162_v3  ;;  %v2446_v11 = vld [vmem:[%s4307_s4 + $0xd8] sm:$0xff] }
 0x101   : > { %v1158_v12 = vld [vmem:[%s4307_s4 + $0x28] sm:$0xff]  ;;  %v2475_v3 = vld [vmem:[%s4308_s5 + $0x110] sm:$0xff] }
 0x102   : > { %v1021_v35 = vadd.f32 %v1013_v25, %v1007_v21  ;;  %v1022_v36 = vadd.f32 %v1014_v26, %v1008_v22  ;;  %1188 = vmatpush.msrb.mxu1 %v1161_v6  ;;  %v2442_v21 = vld [vmem:[%s4307_s4 + $0xb8] sm:$0xff]  ;;  %v1154_v22 = vld [vmem:[%s4307_s4 + $0x8] sm:$0xff]  ;;  %v1303_v6 = vld [vmem:[%s4308_s5 + $0x30] sm:$0xff] }
 0x104   : > { %v1029_v48 = vmax.f32 %v1021_v35, 0.0  ;;  %v1030_v49 = vmax.f32 %v1022_v36, 0.0  ;;  %1189 = vmatpush.msrb.mxu1 %v1160_v8  ;;  %v2473_v8 = vld [vmem:[%s4308_s5 + $0x100] sm:$0xff] }
 0x106   : > { %1190 = vmatpush.msrb.mxu1 %v1159_v10  ;;  %v1301_v10 = vld [vmem:[%s4308_s5 + $0x20] sm:$0xff] }
 0x107   : > { %v971_v27 = vpop.f32.mrf.mxu0  ;;  %v1000_v28 = vpop.f32.mrf.mxu1 }
 0x108   : > { %v1009_v31 = vadd.f32 %v971_v27, %v902_v19  ;;  %v1010_v32 = vadd.f32 %v1000_v28, %v903_v20  ;;  %1191 = vmatpush.msrb.mxu1 %v1158_v12  ;;  %v2458_v19 = vld [vmem:[%s4307_s4 + $0x138] sm:$0xff]  ;;  %v1155_v20 = vld [vmem:[%s4307_s4 + $0x10] sm:$0xff]  ;;  %v2456_v27 = vld [vmem:[%s4307_s4 + $0x128] sm:$0xff] }
 0x109   : > { %v1173_v28 = vld [vmem:[%s4307_s4 + $0xa0] sm:$0xff]  ;;  %v2471_v12 = vld [vmem:[%s4308_s5 + $0xf0] sm:$0xff] }
 0x10a   : > { %v1023_v37 = vadd.f32 %v1013_v25, %v1009_v31  ;;  %v1024_v40 = vadd.f32 %v1014_v26, %v1010_v32  ;;  %1192 = vmatpush.msrb.mxu1 %v1157_v13  ;;  %v1153_v25 = vld [vmem:[%s4307_s4] sm:$0xff]  ;;  %v2440_v26 = vld [vmem:[%s4307_s4 + $0xa8] sm:$0xff]  ;;  %v1299_v13 = vld [vmem:[%s4308_s5 + $0x10] sm:$0xff] }
 0x10b   : > { %v1170_v31 = vld [vmem:[%s4307_s4 + $0x88] sm:$0xff] }
 0x10c   : > { %v1031_v43 = vmax.f32 %v1023_v37, 0.0  ;;  %v1032_v44 = vmax.f32 %v1024_v40, 0.0  ;;  %1193 = vmatpush.msrb.mxu1 %v1156_v16  ;;  %v1317_v37 = vld [vmem:[%s4308_s5 + $0xa0] sm:$0xf]  ;;  %v1318_v40 = vld [vmem:[%s4308_s5 + $0xa8] sm:$0xf] }
 0x10d   : > { %v2470_v16 = vld [vmem:[%s4308_s5 + $0xe8] sm:$0xff] }
 0x10e   : > { %2424 = vmatpush.msk.msra.mxu2 %vm929_vm4, %v1031_v43  ;;  %2427 = vmatpush.msk.msra.mxu3 %vm929_vm4, %v1032_v44 }
 0x10f   : > { %1194 = vmatpush.msrb.mxu1 %v1155_v20  ;;  %v2546_v20 = vld [vmem:[%s4308_s5 + $0x2b8] sm:$0xf] }
 0x110   : > { %1061 = vmatpush.msra.mxu2 %v1029_v48  ;;  %1084 = vmatpush.msra.mxu3 %v1030_v49 }
 0x111   : > { %1195 = vmatpush.msrb.mxu1 %v1154_v22  ;;  %v2468_v22 = vld [vmem:[%s4308_s5 + $0xd8] sm:$0xff] }
 0x112   : > { %1062 = vmatpush.msra.mxu2 %v1027_v51  ;;  %1085 = vmatpush.msra.mxu3 %v1028_v52 }
 0x113   : > { %1196 = vmatpush.msrb.mxu1 %v1153_v25  ;;  %v2465_v25 = vld [vmem:[%s4308_s5 + $0xc0] sm:$0xff] }
 0x114   : > { %1063 = vmatpush.msra.mxu2 %v1025_v55  ;;  %1086 = vmatpush.msra.mxu3 %v1026_v56 }
 0x115   : > { %2425 = vmatmul.msk.f32.vlgmr.msra.gmra.mxu2 %vm1035_vm5, %v1033_v38  ;;  %2428 = vmatmul.msk.f32.vlgmr.msra.gmra.mxu3 %vm1035_vm5, %v1033_v38  ;;  %v1312_v38 = vld [vmem:[%s4308_s5 + $0x78] sm:$0xff] }
 0x116   : > { %2432 = vmatpush.msk.msrb.mxu2 %vm929_vm4, %v1031_v43  ;;  %2435 = vmatpush.msk.msrb.mxu3 %vm929_vm4, %v1032_v44  ;;  %v1313_v43 = vld [vmem:[%s4308_s5 + $0x80] sm:$0xff]  ;;  %v1314_v44 = vld [vmem:[%s4308_s5 + $0x88] sm:$0xff] }
 0x117   : > { %1215 = vmatpush.msra.mxu1 %v1173_v28  ;;  %v2542_v28 = vld [vmem:[%s4308_s5 + $0x298] sm:$0xff] }
 0x118   : > { %1116 = vmatpush.msrb.mxu2 %v1029_v48  ;;  %1139 = vmatpush.msrb.mxu3 %v1030_v49 }
 0x119   : > { %1216 = vmatpush.msra.mxu1 %v1172_v29  ;;  %v2463_v29 = vld [vmem:[%s4308_s5 + $0xb0] sm:$0xff] }
 0x11a   : > { %1117 = vmatpush.msrb.mxu2 %v1027_v51  ;;  %1140 = vmatpush.msrb.mxu3 %v1028_v52 }
 0x11b   : > { %1217 = vmatpush.msra.mxu1 %v1171_v30  ;;  %v2464_v30 = vld [vmem:[%s4308_s5 + $0xb8] sm:$0xff] }
 0x11c   : > { %1118 = vmatpush.msrb.mxu2 %v1025_v55  ;;  %1141 = vmatpush.msrb.mxu3 %v1026_v56  ;;  %v2484_v55 = vld [vmem:[%s4308_s5 + $0x158] sm:$0xf]  ;;  %v1311_v56 = vld [vmem:[%s4308_s5 + $0x70] sm:$0xff] }
 0x11d   : > { %2426 = vmatmul.msk.f32.gmra.mxu2 %vm1035_vm5, %v1034_v59  ;;  %2429 = vmatmul.msk.f32.gmra.mxu3 %vm1035_vm5, %v1034_v59  ;;  %v1310_v59 = vld [vmem:[%s4308_s5 + $0x68] sm:$0xff] }
 0x11e   : > { %1249 = vmatpush.msra.mxu2 %v2455_v60  ;;  %1283 = vmatpush.msra.mxu3 %v2460_v15  ;;  %v2479_v60 = vld [vmem:[%s4308_s5 + $0x130] sm:$0xff]  ;;  %v2469_v15 = vld [vmem:[%s4308_s5 + $0xe0] sm:$0xff] }
 0x11f   : > { %1218 = vmatpush.msra.mxu1 %v1170_v31  ;;  %1365 = vmatpush.msrb.mxu0 %v2479_v60  ;;  %v2517_v31 = vld [vmem:[%s4308_s5 + $0x200] sm:$0xf]  ;;  %v2528_v60 = vld [vmem:[%s4308_s5 + $0x228] sm:$0xff] }
 0x120   : > { %1250 = vmatpush.msra.mxu2 %v2454_v61  ;;  %1284 = vmatpush.msra.mxu3 %v2459_v18  ;;  %v2480_v61 = vld [vmem:[%s4308_s5 + $0x138] sm:$0xff]  ;;  %v1298_v18 = vld [vmem:[%s4308_s5 + $0x8] sm:$0xff] }
 0x121   : > { %1219 = vmatpush.msra.mxu1 %v1169_v34  ;;  %v2540_v34 = vld [vmem:[%s4308_s5 + $0x288] sm:$0xff] }
 0x122   : > { %1251 = vmatpush.msra.mxu2 %v2453_v62  ;;  %1285 = vmatpush.msra.mxu3 %v2458_v19  ;;  %v1307_v62 = vld [vmem:[%s4308_s5 + $0x50] sm:$0xff] }
 0x123   : > { %v2545_v19 = vld [vmem:[%s4308_s5 + $0x2b0] sm:$0xf] }
 0x124   : > { %1252 = vmatpush.msra.mxu2 %v2452_v63  ;;  %1286 = vmatpush.msra.mxu3 %v2457_v24  ;;  %v1308_v63 = vld [vmem:[%s4308_s5 + $0x58] sm:$0xff]  ;;  %v2544_v24 = vld [vmem:[%s4308_s5 + $0x2a8] sm:$0xff] }
 0x125   : > { %2433 = vmatmul.msk.f32.vlgmr.msrb.gmra.mxu2 %vm1035_vm5, %v2430_v0  ;;  %2436 = vmatmul.msk.f32.vlgmr.msrb.gmra.mxu3 %vm1035_vm5, %v2430_v0  ;;  %v2477_v0 = vld [vmem:[%s4308_s5 + $0x120] sm:$0xff] }
 0x126   : > { %1253 = vmatpush.msra.mxu2 %v2451_v53  ;;  %1287 = vmatpush.msra.mxu3 %v2456_v27  ;;  %v2478_v53 = vld [vmem:[%s4308_s5 + $0x128] sm:$0xff]  ;;  %v2541_v27 = vld [vmem:[%s4308_s5 + $0x290] sm:$0xff] }
 0x127   : > { %1366 = vmatpush.msrb.mxu0 %v2477_v0  ;;  %v2526_v0 = vld [vmem:[%s4308_s5 + $0x218] sm:$0xff] }
 0x128   : > { %1254 = vmatpush.msra.mxu2 %v2450_v1  ;;  %2491 = vmatpush.msk.msrb.mxu3 %vm929_vm4, %v1317_v37  ;;  %v1305_v1 = vld [vmem:[%s4308_s5 + $0x40] sm:$0xff]  ;;  %v2537_v37 = vld [vmem:[%s4308_s5 + $0x270] sm:$0xff] }
 0x129   : > { %1367 = vmatpush.msrb.mxu0 %v2475_v3  ;;  %v2499_v3 = vld [vmem:[%s4308_s5 + $0x170] sm:$0xff] }
 0x12a   : > { %1255 = vmatpush.msra.mxu2 %v2449_v5  ;;  %1420 = vmatpush.msrb.mxu3 %v1315_v41  ;;  %v2476_v5 = vld [vmem:[%s4308_s5 + $0x118] sm:$0xff]  ;;  %v2513_v41 = vld [vmem:[%s4308_s5 + $0x1e0] sm:$0xff] }
 0x12b   : > { %1368 = vmatpush.msrb.mxu0 %v2473_v8 }
 0x12c   : > { %1256 = vmatpush.msra.mxu2 %v2448_v7  ;;  %1421 = vmatpush.msrb.mxu3 %v1313_v43  ;;  %v1304_v7 = vld [vmem:[%s4308_s5 + $0x38] sm:$0xff]  ;;  %v2535_v43 = vld [vmem:[%s4308_s5 + $0x260] sm:$0xff] }
 0x12d   : > { %2434 = vmatmul.msk.f32.gmra.mxu2 %vm1035_vm5, %v2431_v2  ;;  %2437 = vmatmul.msk.f32.gmra.mxu3 %vm1035_vm5, %v2431_v2  ;;  %v1306_v2 = vld [vmem:[%s4308_s5 + $0x48] sm:$0xff] }
 0x12e   : > { %1257 = vmatpush.msra.mxu2 %v2447_v9  ;;  %1422 = vmatpush.msrb.mxu3 %v1311_v56  ;;  %v2474_v9 = vld [vmem:[%s4308_s5 + $0x108] sm:$0xff]  ;;  %v2508_v56 = vld [vmem:[%s4308_s5 + $0x1b8] sm:$0xff] }
 0x12f   : > { %1369 = vmatpush.msrb.mxu0 %v2471_v12 }
 0x130   : > { %1258 = vmatpush.msra.mxu2 %v2446_v11  ;;  %1423 = vmatpush.msrb.mxu3 %v1309_v58  ;;  %v1302_v11 = vld [vmem:[%s4308_s5 + $0x28] sm:$0xff] }
 0x131   : > { %1370 = vmatpush.msrb.mxu0 %v2469_v15  ;;  %v2506_v58 = vld [vmem:[%s4308_s5 + $0x1a8] sm:$0xff] }
 0x132   : > { %1259 = vmatpush.msra.mxu2 %v2445_v4  ;;  %1424 = vmatpush.msrb.mxu3 %v1307_v62  ;;  %v2472_v4 = vld [vmem:[%s4308_s5 + $0xf8] sm:$0xff] }
 0x133   : > { %v2504_v62 = vld [vmem:[%s4308_s5 + $0x198] sm:$0xff] }
 0x134   : > { %1260 = vmatpush.msra.mxu2 %v2444_v14  ;;  %1425 = vmatpush.msrb.mxu3 %v1305_v1  ;;  %v1300_v14 = vld [vmem:[%s4308_s5 + $0x18] sm:$0xff]  ;;  %v2502_v1 = vld [vmem:[%s4308_s5 + $0x188] sm:$0xff] }
 0x136   : > { %1261 = vmatpush.msra.mxu2 %v2443_v17  ;;  %1426 = vmatpush.msrb.mxu3 %v1303_v6  ;;  %v1297_v17 = vld [vmem:[%s4308_s5] sm:$0xff] }
 0x137   : > { %v2497_v6 = vld [vmem:[%s4308_s5 + $0x160] sm:$0xff] }
 0x138   : > { %1262 = vmatpush.msra.mxu2 %v2442_v21  ;;  %1427 = vmatpush.msrb.mxu3 %v1301_v10  ;;  %v2467_v21 = vld [vmem:[%s4308_s5 + $0xd0] sm:$0xff] }
 0x139   : > { %1371 = vmatpush.msrb.mxu0 %v2467_v21  ;;  %v2573_v21 = vld [vmem:[%s4308_s5 + $0x360] sm:$0xf] }
 0x13a   : > { %1263 = vmatpush.msra.mxu2 %v2441_v23  ;;  %1428 = vmatpush.msrb.mxu3 %v1299_v13  ;;  %v2543_v23 = vld [vmem:[%s4308_s5 + $0x2a0] sm:$0xff] }
 0x13b   : > { %1372 = vmatpush.msrb.mxu0 %v2465_v25  ;;  %v2571_v25 = vld [vmem:[%s4308_s5 + $0x350] sm:$0xff] }
 0x13c   : > { %1264 = vmatpush.msra.mxu2 %v2440_v26  ;;  %1429 = vmatpush.msrb.mxu3 %v1297_v17  ;;  %v2466_v26 = vld [vmem:[%s4308_s5 + $0xc8] sm:$0xff] }
 0x13d   : > { %1373 = vmatpush.msrb.mxu0 %v2463_v29  ;;  %v2570_v29 = vld [vmem:[%s4308_s5 + $0x348] sm:$0xff] }
 0x13e   : > { %2494 = vmatpush.msk.msrb.mxu2 %vm929_vm4, %v1318_v40  ;;  %v2538_v40 = vld [vmem:[%s4308_s5 + $0x278] sm:$0xff] }
 0x13f   : > { %2519 = vmatpush.msk.msra.mxu0 %vm929_vm4, %v2517_v31  ;;  %v2567_v31 = vld [vmem:[%s4308_s5 + $0x330] sm:$0xff] }
 0x140   : > { %1443 = vmatpush.msrb.mxu2 %v1316_v42  ;;  %v2514_v42 = vld [vmem:[%s4308_s5 + $0x1e8] sm:$0xff] }
 0x142   : > { %1444 = vmatpush.msrb.mxu2 %v1314_v44  ;;  %v2536_v44 = vld [vmem:[%s4308_s5 + $0x268] sm:$0xff] }
 0x144   : > { %1445 = vmatpush.msrb.mxu2 %v1312_v38  ;;  %v2529_v38 = vld [vmem:[%s4308_s5 + $0x230] sm:$0xff] }
 0x146   : > { %1446 = vmatpush.msrb.mxu2 %v1310_v59  ;;  %v2527_v59 = vld [vmem:[%s4308_s5 + $0x220] sm:$0xff] }
 0x148   : > { %1447 = vmatpush.msrb.mxu2 %v1308_v63  ;;  %v2525_v63 = vld [vmem:[%s4308_s5 + $0x210] sm:$0xff] }
 0x14a   : > { %1448 = vmatpush.msrb.mxu2 %v1306_v2 }
 0x14c   : > { %1449 = vmatpush.msrb.mxu2 %v1304_v7  ;;  %v2498_v7 = vld [vmem:[%s4308_s5 + $0x168] sm:$0xff] }
 0x14e   : > { %1450 = vmatpush.msrb.mxu2 %v1302_v11 }
 0x150   : > { %1451 = vmatpush.msrb.mxu2 %v1300_v14 }
 0x152   : > { %1452 = vmatpush.msrb.mxu2 %v1298_v18 }
 0x198   : > { %v1065_v32 = vpop.f32.mrf.mxu2  ;;  %v1088_v33 = vpop.f32.mrf.mxu3 }
 0x1a0   : > { %v1068_v35 = vpop.f32.mrf.mxu2  ;;  %v1091_v36 = vpop.f32.mrf.mxu3 }
 0x1a8   : > { %v1120_v45 = vpop.f32.mrf.mxu2  ;;  %v1143_v46 = vpop.f32.mrf.mxu3 }
 0x1a9   : > { %v1149_v47 = vmax.f32 %v1065_v32, %v1120_v45  ;;  %v1150_v48 = vmax.f32 %v1088_v33, %v1143_v46  ;;  %v2518_v32 = vld [vmem:[%s4308_s5 + $0x208] sm:$0xf]  ;;  %v2539_v33 = vld [vmem:[%s4308_s5 + $0x280] sm:$0xff]  ;;  %v2511_v45 = vld [vmem:[%s4308_s5 + $0x1d0] sm:$0xff] }
 0x1aa   : > { %v2512_v46 = vld [vmem:[%s4308_s5 + $0x1d8] sm:$0xff] }
 0x1ab   : > { %1197 = vmatmul.f32.vlgmr.msrb.gmra.mxu1 %v1149_v47  ;;  %1265 = vmatmul.f32.vlgmr.msra.gmra.mxu2 %v1149_v47  ;;  %v2533_v47 = vld [vmem:[%s4308_s5 + $0x250] sm:$0xff] }
 0x1ac   : > { %2461 = vmatmul.msk.f32.vlgmr.msra.gmra.mxu3 %vm1174_vm6, %v1150_v48  ;;  %2488 = vmatpush.msk.msrb.mxu1 %vm929_vm4, %v2484_v55  ;;  %v2507_v55 = vld [vmem:[%s4308_s5 + $0x1b0] sm:$0xff] }
 0x1ad   : > { %2547 = vmatpush.msk.msra.mxu3 %vm929_vm4, %v2545_v19  ;;  %2550 = vmatpush.msk.msra.mxu2 %vm929_vm4, %v2546_v20 }
 0x1ae   : > { %1387 = vmatpush.msrb.mxu1 %v2482_v57  ;;  %v2505_v57 = vld [vmem:[%s4308_s5 + $0x1a0] sm:$0xff] }
 0x1af   : > { %1588 = vmatpush.msra.mxu3 %v2543_v23  ;;  %1611 = vmatpush.msra.mxu2 %v2544_v24 }
 0x1b0   : > { %v1123_v49 = vpop.f32.mrf.mxu2  ;;  %v1146_v50 = vpop.f32.mrf.mxu3  ;;  %1388 = vmatpush.msrb.mxu1 %v2480_v61  ;;  %v2503_v61 = vld [vmem:[%s4308_s5 + $0x190] sm:$0xff] }
 0x1b1   : > { %v1151_v51 = vmax.f32 %v1068_v35, %v1123_v49  ;;  %v1152_v52 = vmax.f32 %v1091_v36, %v1146_v50  ;;  %1589 = vmatpush.msra.mxu3 %v2541_v27  ;;  %1612 = vmatpush.msra.mxu2 %v2542_v28  ;;  %v2515_v35 = vld [vmem:[%s4308_s5 + $0x1f0] sm:$0xff]  ;;  %v2516_v36 = vld [vmem:[%s4308_s5 + $0x1f8] sm:$0xff]  ;;  %v2509_v49 = vld [vmem:[%s4308_s5 + $0x1c0] sm:$0xff] }
 0x1b2   : > { %1389 = vmatpush.msrb.mxu1 %v2478_v53  ;;  %1502 = vmatpush.msra.mxu0 %v2515_v35  ;;  %v2510_v50 = vld [vmem:[%s4308_s5 + $0x1c8] sm:$0xff]  ;;  %v2501_v53 = vld [vmem:[%s4308_s5 + $0x180] sm:$0xff] }
 0x1b3   : > { %1200 = vmatmul.f32.gmra.mxu1 %v1151_v51  ;;  %1268 = vmatmul.f32.gmra.mxu2 %v1151_v51  ;;  %v2531_v51 = vld [vmem:[%s4308_s5 + $0x240] sm:$0xff] }
 0x1b4   : > { %2462 = vmatmul.msk.f32.gmra.mxu3 %vm1174_vm6, %v1152_v52  ;;  %1390 = vmatpush.msrb.mxu1 %v2476_v5  ;;  %v2500_v5 = vld [vmem:[%s4308_s5 + $0x178] sm:$0xff]  ;;  %v2569_v28 = vld [vmem:[%s4308_s5 + $0x340] sm:$0xff] }
 0x1b5   : > { %1590 = vmatpush.msra.mxu3 %v2539_v33  ;;  %1613 = vmatpush.msra.mxu2 %v2540_v34  ;;  %v2565_v33 = vld [vmem:[%s4308_s5 + $0x320] sm:$0xff]  ;;  %v2566_v34 = vld [vmem:[%s4308_s5 + $0x328] sm:$0xff] }
 0x1b6   : > { %1391 = vmatpush.msrb.mxu1 %v2474_v9  ;;  %1503 = vmatpush.msra.mxu0 %v2513_v41  ;;  %v2561_v41 = vld [vmem:[%s4308_s5 + $0x300] sm:$0xff] }
 0x1b7   : > { %1591 = vmatpush.msra.mxu3 %v2537_v37  ;;  %1614 = vmatpush.msra.mxu2 %v2538_v40  ;;  %v2564_v37 = vld [vmem:[%s4308_s5 + $0x318] sm:$0xff] }
 0x1b8   : > { %1392 = vmatpush.msrb.mxu1 %v2472_v4  ;;  %1504 = vmatpush.msra.mxu0 %v2511_v45  ;;  %v2560_v45 = vld [vmem:[%s4308_s5 + $0x2f8] sm:$0xff] }
 0x1b9   : > { %1592 = vmatpush.msra.mxu3 %v2535_v43  ;;  %1615 = vmatpush.msra.mxu2 %v2536_v44  ;;  %v2559_v44 = vld [vmem:[%s4308_s5 + $0x2f0] sm:$0xff] }
 0x1ba   : > { %1393 = vmatpush.msrb.mxu1 %v2470_v16  ;;  %1505 = vmatpush.msra.mxu0 %v2509_v49  ;;  %v2556_v49 = vld [vmem:[%s4308_s5 + $0x2d8] sm:$0xff] }
 0x1bb   : > { %2438 = vmatmul.msk.f32.vlgmr.msra.gmra.mxu1 %vm1174_vm6, %v1150_v48  ;;  %v2534_v48 = vld [vmem:[%s4308_s5 + $0x258] sm:$0xff]  ;;  %1593 = vmatpush.msra.mxu3 %v2533_v47  ;;  %v2558_v47 = vld [vmem:[%s4308_s5 + $0x2e8] sm:$0xff] }
 0x1bc   : > { %1394 = vmatpush.msrb.mxu1 %v2468_v22  ;;  %1616 = vmatpush.msra.mxu2 %v2534_v48  ;;  %v2574_v22 = vld [vmem:[%s4308_s5 + $0x368] sm:$0xf]  ;;  %v2555_v48 = vld [vmem:[%s4308_s5 + $0x2d0] sm:$0xff] }
 0x1bd   : > { %1594 = vmatpush.msra.mxu3 %v2531_v51  ;;  %1506 = vmatpush.msra.mxu0 %v2507_v55  ;;  %v2554_v51 = vld [vmem:[%s4308_s5 + $0x2c8] sm:$0xff] }
 0x1be   : > { %1395 = vmatpush.msrb.mxu1 %v2466_v26  ;;  %v2572_v26 = vld [vmem:[%s4308_s5 + $0x358] sm:$0xff] }
 0x1bf   : > { %1595 = vmatpush.msra.mxu3 %v2529_v38  ;;  %1507 = vmatpush.msra.mxu0 %v2505_v57 }
 0x1c0   : > { %1396 = vmatpush.msrb.mxu1 %v2464_v30 }
 0x1c1   : > { %1596 = vmatpush.msra.mxu3 %v2527_v59  ;;  %1508 = vmatpush.msra.mxu0 %v2503_v61 }
 0x1c2   : > { %2522 = vmatpush.msk.msra.mxu1 %vm929_vm4, %v2518_v32  ;;  %v2568_v32 = vld [vmem:[%s4308_s5 + $0x338] sm:$0xff] }
 0x1c3   : > { %2439 = vmatmul.msk.f32.gmra.mxu1 %vm1174_vm6, %v1152_v52  ;;  %v2532_v52 = vld [vmem:[%s4308_s5 + $0x248] sm:$0xff]  ;;  %1597 = vmatpush.msra.mxu3 %v2525_v63 }
 0x1c4   : > { %1525 = vmatpush.msra.mxu1 %v2516_v36  ;;  %1617 = vmatpush.msra.mxu2 %v2532_v52  ;;  %v2563_v36 = vld [vmem:[%s4308_s5 + $0x310] sm:$0xff] }
 0x1c5   : > { %1509 = vmatpush.msra.mxu0 %v2501_v53 }
 0x1c6   : > { %1526 = vmatpush.msra.mxu1 %v2514_v42  ;;  %1618 = vmatpush.msra.mxu2 %v2530_v39  ;;  %v2562_v42 = vld [vmem:[%s4308_s5 + $0x308] sm:$0xff] }
 0x1c7   : > { %1510 = vmatpush.msra.mxu0 %v2499_v3 }
 0x1c8   : > { %1527 = vmatpush.msra.mxu1 %v2512_v46  ;;  %1619 = vmatpush.msra.mxu2 %v2528_v60  ;;  %v2557_v46 = vld [vmem:[%s4308_s5 + $0x2e0] sm:$0xff] }
 0x1c9   : > { %1511 = vmatpush.msra.mxu0 %v2497_v6 }
 0x1ca   : > { %1528 = vmatpush.msra.mxu1 %v2510_v50  ;;  %1620 = vmatpush.msra.mxu2 %v2526_v0  ;;  %v2553_v50 = vld [vmem:[%s4308_s5 + $0x2c0] sm:$0xff] }
 0x1cc   : > { %1529 = vmatpush.msra.mxu1 %v2508_v56 }
 0x1ce   : > { %1530 = vmatpush.msra.mxu1 %v2506_v58 }
 0x1d0   : > { %1531 = vmatpush.msra.mxu1 %v2504_v62 }
 0x1d2   : > { %1532 = vmatpush.msra.mxu1 %v2502_v1 }
 0x1d4   : > { %1533 = vmatpush.msra.mxu1 %v2500_v5 }
 0x1d6   : > { %1534 = vmatpush.msra.mxu1 %v2498_v7 }
 0x228   : > { %v1198_v54 = vpop.f32.mrf.mxu1 }
 0x22e   : > { %v1266_v8 = vpop.f32.mrf.mxu2 }
 0x22f   : > { %v1289_v9 = vpop.f32.mrf.mxu3 }
 0x230   : > { %v1201_v2 = vpop.f32.mrf.mxu1  ;;  %v1290_v11 = vadd.f32 %v1289_v9, %v1266_v8 }
 0x236   : > { %v1269_v13 = vpop.f32.mrf.mxu2 }
 0x237   : > { %v1292_v14 = vpop.f32.mrf.mxu3 }
 0x238   : > { %v1221_v10 = vpop.f32.mrf.mxu1  ;;  %v1293_v16 = vadd.f32 %v1292_v14, %v1269_v13  ;;  %v1718_v14 = vld [vmem:[%s4309_s6] sm:$0x3] }
 0x239   : > { %v1222_v12 = vadd.f32 %v1221_v10, %v1198_v54  ;;  %v1846_v10 = vld [vmem:[%s4311_s8 + $0x78] sm:$0xff] }
 0x23b   : > { %v3787_v4 = vmax.f32 %v1222_v12, %v1290_v11  ;;  %v1845_v11 = vld [vmem:[%s4311_s8 + $0x70] sm:$0xff] }
 0x23d   : > { %2492 = vmatmul.msk.f32.vlgmr.msrb.gmra.mxu3 %vm1347_vm7, %v3787_v4  ;;  %2495 = vmatmul.msk.f32.vlgmr.msrb.gmra.mxu2 %vm1347_vm7, %v3787_v4  ;;  %v1344_v19 = vrot.slane %v3787_v4, 1  ;;  %v1569_v27 = vrot.slane %v3787_v4, 3  ;;  %v1483_v40 = vrot.slane %v3787_v4, 2  ;;  %v1655_v54 = vrot.slane %v3787_v4, 4 }
 0x240   : > { %v1224_v15 = vpop.f32.mrf.mxu1 }
 0x241   : > { %v1225_v17 = vadd.f32 %v1224_v15, %v1201_v2  ;;  %v1844_v15 = vld [vmem:[%s4311_s8 + $0x68] sm:$0xff] }
 0x243   : > { %v3793_v18 = vmax.f32 %v1225_v17, %v1293_v16 }
 0x245   : > { %2493 = vmatmul.msk.f32.gmra.mxu3 %vm1347_vm7, %v3793_v18  ;;  %2496 = vmatmul.msk.f32.gmra.mxu2 %vm1347_vm7, %v3793_v18  ;;  %v1345_v20 = vrot.slane %v3793_v18, 1  ;;  %v1570_v24 = vrot.slane %v3793_v18, 3  ;;  %v1484_v35 = vrot.slane %v3793_v18, 2  ;;  %v1656_v52 = vrot.slane %v3793_v18, 4 }
 0x247   : > { %v1346_v23 = vsel %vm549_vm0, %v1344_v19, %v1345_v20  ;;  %v1571_v30 = vsel %vm822_vm3, %v1569_v27, %v1570_v24  ;;  %v1485_v43 = vsel %vm715_vm2, %v1483_v40, %v1484_v35  ;;  %v1657_v55 = vsel %vm929_vm4, %v1655_v54, %v1656_v52  ;;  %v1842_v27 = vld [vmem:[%s4311_s8 + $0x58] sm:$0xff]  ;;  %v1840_v40 = vld [vmem:[%s4311_s8 + $0x48] sm:$0xff] }
 0x248   : > { %2486 = vmatmul.msk.f32.vlgmr.msrb.gmra.mxu0 %vm1347_vm7, %v1346_v23  ;;  %2489 = vmatmul.msk.f32.vlgmr.msrb.gmra.mxu1 %vm1347_vm7, %v1346_v23  ;;  %v2600_v54 = vld [vmem:[%s4311_s8 + $0xe8] sm:$0xff] }
 0x249   : > { %2575 = vmatpush.msk.msrb.mxu0 %vm929_vm4, %v2573_v21  ;;  %2578 = vmatpush.msk.msrb.mxu1 %vm929_vm4, %v2574_v22  ;;  %v1720_v22 = vperm.slane %v1718_v14, 0 }
 0x24b   : > { %1674 = vmatpush.msrb.mxu0 %v2571_v25  ;;  %1697 = vmatpush.msrb.mxu1 %v2572_v26 }
 0x24d   : > { %2548 = vmatmul.msk.f32.vlgmr.msra.gmra.mxu3 %vm1347_vm7, %v1571_v30  ;;  %2551 = vmatmul.msk.f32.vlgmr.msra.gmra.mxu2 %vm1347_vm7, %v1571_v30 }
 0x24e   : > { %1675 = vmatpush.msrb.mxu0 %v2569_v28  ;;  %1698 = vmatpush.msrb.mxu1 %v2570_v29 }
 0x250   : > { %2487 = vmatmul.msk.f32.gmra.mxu0 %vm1347_vm7, %v1345_v20  ;;  %2490 = vmatmul.msk.f32.gmra.mxu1 %vm1347_vm7, %v1345_v20  ;;  %v1843_v20 = vld [vmem:[%s4311_s8 + $0x60] sm:$0xff] }
 0x251   : > { %1676 = vmatpush.msrb.mxu0 %v2567_v31  ;;  %1699 = vmatpush.msrb.mxu1 %v2568_v32  ;;  %v1841_v31 = vld [vmem:[%s4311_s8 + $0x50] sm:$0xff] }
 0x253   : > { %1677 = vmatpush.msrb.mxu0 %v2565_v33  ;;  %1700 = vmatpush.msrb.mxu1 %v2566_v34  ;;  %v1721_v34 = vperm.slane %v1718_v14, 1  ;;  %v1966_v14 = vld [vmem:[%s4312_s9 + $0x48] sm:$0xff] }
 0x255   : > { %2549 = vmatmul.msk.f32.gmra.mxu3 %vm1347_vm7, %v1570_v24  ;;  %2552 = vmatmul.msk.f32.gmra.mxu2 %vm1347_vm7, %v1570_v24 }
 0x256   : > { %1678 = vmatpush.msrb.mxu0 %v2563_v36  ;;  %1701 = vmatpush.msrb.mxu1 %v2564_v37 }
 0x258   : > { %2520 = vmatmul.msk.f32.vlgmr.msra.gmra.mxu0 %vm1347_vm7, %v1485_v43  ;;  %2523 = vmatmul.msk.f32.vlgmr.msra.gmra.mxu1 %vm1347_vm7, %v1485_v43  ;;  %v1732_v43 = vld [vmem:[%s4310_s7] sm:$0x1f] }
 0x259   : > { %1679 = vmatpush.msrb.mxu0 %v2561_v41  ;;  %1702 = vmatpush.msrb.mxu1 %v2562_v42 }
 0x25b   : > { %1680 = vmatpush.msrb.mxu0 %v2559_v44  ;;  %1703 = vmatpush.msrb.mxu1 %v2560_v45  ;;  %v2585_v44 = vld [vmem:[%s4310_s7 + $0x8] sm:$0x1f]  ;;  %v2606_v45 = vld [vmem:[%s4311_s8 + $0x118] sm:$0xff] }
 0x25d   : > { %1681 = vmatpush.msrb.mxu0 %v2557_v46  ;;  %1704 = vmatpush.msrb.mxu1 %v2558_v47  ;;  %v2605_v47 = vld [vmem:[%s4311_s8 + $0x110] sm:$0xff] }
 0x25f   : > { %1682 = vmatpush.msrb.mxu0 %v2555_v48  ;;  %1705 = vmatpush.msrb.mxu1 %v2556_v49  ;;  %v2604_v49 = vld [vmem:[%s4311_s8 + $0x108] sm:$0xff] }
 0x260   : > { %2521 = vmatmul.msk.f32.gmra.mxu0 %vm1347_vm7, %v1484_v35  ;;  %2524 = vmatmul.msk.f32.gmra.mxu1 %vm1347_vm7, %v1484_v35 }
 0x261   : > { %1683 = vmatpush.msrb.mxu0 %v2553_v50  ;;  %1706 = vmatpush.msrb.mxu1 %v2554_v51  ;;  %v2603_v50 = vld [vmem:[%s4311_s8 + $0x100] sm:$0xff]  ;;  %v2602_v51 = vld [vmem:[%s4311_s8 + $0xf8] sm:$0xff] }
 0x263   : > { %1855 = vmatpush.msra.mxu0 %v1846_v10  ;;  %v1849_v10 = vld [vmem:[%s4311_s8 + $0x90] sm:$0xff] }
 0x265   : > { %1856 = vmatpush.msra.mxu0 %v1845_v11  ;;  %v2608_v11 = vld [vmem:[%s4311_s8 + $0x128] sm:$0xff] }
 0x267   : > { %1857 = vmatpush.msra.mxu0 %v1844_v15  ;;  %v2621_v15 = vld [vmem:[%s4312_s9 + $0x98] sm:$0xff] }
 0x268   : > { %2576 = vmatmul.msk.f32.vlgmr.msrb.gmra.mxu0 %vm1347_vm7, %v1657_v55  ;;  %2579 = vmatmul.msk.f32.vlgmr.msrb.gmra.mxu1 %vm1347_vm7, %v1657_v55  ;;  %v1839_v55 = vld [vmem:[%s4311_s8 + $0x40] sm:$0xff] }
 0x269   : > { %1858 = vmatpush.msra.mxu0 %v1843_v20  ;;  %1989 = vmatpush.msra.mxu1 %v2621_v15  ;;  %v1963_v20 = vld [vmem:[%s4312_s9 + $0x30] sm:$0xff] }
 0x26b   : > { %1859 = vmatpush.msra.mxu0 %v1842_v27  ;;  %v2615_v27 = vld [vmem:[%s4312_s9 + $0x68] sm:$0xff] }
 0x26d   : > { %1860 = vmatpush.msra.mxu0 %v1841_v31 }
 0x26f   : > { %1861 = vmatpush.msra.mxu0 %v1840_v40  ;;  %v2613_v40 = vld [vmem:[%s4312_s9 + $0x58] sm:$0xff] }
 0x270   : > { %2577 = vmatmul.msk.f32.gmra.mxu0 %vm1347_vm7, %v1656_v52  ;;  %2580 = vmatmul.msk.f32.gmra.mxu1 %vm1347_vm7, %v1656_v52  ;;  %v2601_v52 = vld [vmem:[%s4311_s8 + $0xf0] sm:$0xff] }
 0x271   : > { %1862 = vmatpush.msra.mxu0 %v1839_v55  ;;  %v2652_v55 = vld [vmem:[%s4312_s9 + $0x170] sm:$0xff] }
 0x2c0   : > { %v1431_v39 = vpop.f32.mrf.mxu3  ;;  %v1454_v57 = vpop.f32.mrf.mxu2 }
 0x2c5   : > { %v1375_v56 = vpop.f32.mrf.mxu0  ;;  %v1398_v38 = vpop.f32.mrf.mxu1 }
 0x2c6   : > { %v1432_v3 = vadd.f32 %v1431_v39, %v1375_v56  ;;  %v1455_v12 = vadd.f32 %v1454_v57, %v1398_v38  ;;  %v2599_v56 = vld [vmem:[%s4311_s8 + $0xe0] sm:$0xff]  ;;  %v1838_v38 = vld [vmem:[%s4311_s8 + $0x38] sm:$0xff]  ;;  %v1837_v57 = vld [vmem:[%s4311_s8 + $0x30] sm:$0xff] }
 0x2c7   : > { %v2598_v39 = vld [vmem:[%s4311_s8 + $0xd8] sm:$0xff]  ;;  %1863 = vmatpush.msra.mxu0 %v1838_v38  ;;  %v2641_v38 = vld [vmem:[%s4312_s9 + $0x120] sm:$0xff] }
 0x2c8   : > { %v1434_v62 = vpop.f32.mrf.mxu3  ;;  %v1457_v63 = vpop.f32.mrf.mxu2 }
 0x2c9   : > { %1864 = vmatpush.msra.mxu0 %v1837_v57  ;;  %v2626_v57 = vld [vmem:[%s4312_s9 + $0xb0] sm:$0xff] }
 0x2cd   : > { %v1378_v58 = vpop.f32.mrf.mxu0  ;;  %v1401_v59 = vpop.f32.mrf.mxu1 }
 0x2ce   : > { %v1435_v7 = vadd.f32 %v1434_v62, %v1378_v58  ;;  %v1458_v8 = vadd.f32 %v1457_v63, %v1401_v59  ;;  %v2597_v58 = vld [vmem:[%s4311_s8 + $0xd0] sm:$0xff]  ;;  %v1836_v59 = vld [vmem:[%s4311_s8 + $0x28] sm:$0xff]  ;;  %v2595_v62 = vld [vmem:[%s4311_s8 + $0xc0] sm:$0xff] }
 0x2cf   : > { %1865 = vmatpush.msra.mxu0 %v1836_v59  ;;  %v1834_v63 = vld [vmem:[%s4311_s8 + $0x18] sm:$0xff]  ;;  %v2650_v59 = vld [vmem:[%s4312_s9 + $0x160] sm:$0xff] }
 0x2d0   : > { %v1599_v1 = vpop.f32.mrf.mxu3  ;;  %v1622_v2 = vpop.f32.mrf.mxu2 }
 0x2d5   : > { %v1513_v60 = vpop.f32.mrf.mxu0  ;;  %v1536_v61 = vpop.f32.mrf.mxu1 }
 0x2d6   : > { %v1542_v9 = vadd.f32 %v1513_v60, %v1432_v3  ;;  %v1543_v16 = vadd.f32 %v1536_v61, %v1455_v12  ;;  %v2596_v60 = vld [vmem:[%s4311_s8 + $0xc8] sm:$0xff]  ;;  %v1835_v61 = vld [vmem:[%s4311_s8 + $0x20] sm:$0xff] }
 0x2d7   : > { %1866 = vmatpush.msra.mxu0 %v1835_v61  ;;  %v2592_v3 = vld [vmem:[%s4311_s8 + $0xa8] sm:$0xff]  ;;  %v2639_v61 = vld [vmem:[%s4312_s9 + $0x110] sm:$0xff] }
 0x2d8   : > { %v1628_v17 = vadd.f32 %v1599_v1, %v1542_v9  ;;  %v1602_v18 = vpop.f32.mrf.mxu3  ;;  %v1625_v19 = vpop.f32.mrf.mxu2  ;;  %v1629_v28 = vadd.f32 %v1622_v2, %v1543_v16  ;;  %v2593_v1 = vld [vmem:[%s4311_s8 + $0xb0] sm:$0xff]  ;;  %v1832_v2 = vld [vmem:[%s4311_s8 + $0x8] sm:$0xff]  ;;  %v1850_v9 = vld [vmem:[%s4311_s8 + $0x98] sm:$0xff] }
 0x2d9   : > { %1867 = vmatpush.msra.mxu0 %v1834_v63  ;;  %v1848_v12 = vld [vmem:[%s4311_s8 + $0x88] sm:$0xff]  ;;  %v1965_v16 = vld [vmem:[%s4312_s9 + $0x40] sm:$0xff] }
 0x2da   : > { %v2624_v63 = vld [vmem:[%s4312_s9 + $0xa0] sm:$0xff] }
 0x2dd   : > { %v1516_v0 = vpop.f32.mrf.mxu0  ;;  %v1539_v53 = vpop.f32.mrf.mxu1 }
 0x2de   : > { %v1544_v4 = vadd.f32 %v1516_v0, %v1435_v7  ;;  %v1545_v13 = vadd.f32 %v1539_v53, %v1458_v8  ;;  %v2594_v0 = vld [vmem:[%s4311_s8 + $0xb8] sm:$0xff]  ;;  %v1833_v53 = vld [vmem:[%s4311_s8 + $0x10] sm:$0xff] }
 0x2df   : > { %1868 = vmatpush.msra.mxu0 %v1833_v53  ;;  %v2610_v7 = vld [vmem:[%s4311_s8 + $0x138] sm:$0xff]  ;;  %v2609_v8 = vld [vmem:[%s4311_s8 + $0x130] sm:$0xff] }
 0x2e0   : > { %v1630_v23 = vadd.f32 %v1602_v18, %v1544_v4  ;;  %v1631_v24 = vadd.f32 %v1625_v19, %v1545_v13  ;;  %v2607_v4 = vld [vmem:[%s4311_s8 + $0x120] sm:$0xff]  ;;  %v1964_v18 = vld [vmem:[%s4312_s9 + $0x38] sm:$0xff]  ;;  %v2619_v19 = vld [vmem:[%s4312_s9 + $0x88] sm:$0xff] }
 0x2e1   : > { %1869 = vmatpush.msra.mxu0 %v1832_v2  ;;  %v1847_v13 = vld [vmem:[%s4311_s8 + $0x80] sm:$0xff]  ;;  %v2648_v53 = vld [vmem:[%s4312_s9 + $0x150] sm:$0xff]  ;;  %v2647_v2 = vld [vmem:[%s4312_s9 + $0x148] sm:$0xff] }
 0x2e5   : > { %v1685_v5 = vpop.f32.mrf.mxu0  ;;  %v1708_v6 = vpop.f32.mrf.mxu1 }
 0x2e6   : > { %v1714_v21 = vadd.f32 %v1685_v5, %v1628_v17  ;;  %v1715_v33 = vadd.f32 %v1708_v6, %v1629_v28  ;;  %v1831_v5 = vld [vmem:[%s4311_s8] sm:$0xff]  ;;  %v2620_v17 = vld [vmem:[%s4312_s9 + $0x90] sm:$0xff] }
 0x2e7   : > { %v2591_v6 = vld [vmem:[%s4311_s8 + $0xa0] sm:$0xff]  ;;  %1870 = vmatpush.msra.mxu0 %v1831_v5  ;;  %1990 = vmatpush.msra.mxu1 %v2620_v17  ;;  %v1959_v28 = vld [vmem:[%s4312_s9 + $0x10] sm:$0xff] }
 0x2e8   : > { %v1724_v32 = vadd.f32 %v1720_v22, %v1714_v21  ;;  %v1725_v42 = vadd.f32 %v1721_v34, %v1715_v33  ;;  %v2618_v21 = vld [vmem:[%s4312_s9 + $0x80] sm:$0xff]  ;;  %v1958_v33 = vld [vmem:[%s4312_s9 + $0x8] sm:$0xff] }
 0x2e9   : > { %1887 = vmatpush.msrb.mxu0 %v1850_v9  ;;  %1991 = vmatpush.msra.mxu1 %v2619_v19  ;;  %v2646_v5 = vld [vmem:[%s4312_s9 + $0x140] sm:$0xff] }
 0x2ea   : > { %v1728_v41 = vmax.f32 %v1724_v32, 0.0  ;;  %v1729_v48 = vmax.f32 %v1725_v42, 0.0  ;;  %v2632_v42 = vld [vmem:[%s4312_s9 + $0xe0] sm:$0xff] }
 0x2eb   : > { %1888 = vmatpush.msrb.mxu0 %v1849_v10  ;;  %1992 = vmatpush.msra.mxu1 %v2618_v21  ;;  %v2145_v9 = vld [vmem:[%s4314_s11 + $0x60] sm:$0xff]  ;;  %v2144_v10 = vld [vmem:[%s4314_s11 + $0x58] sm:$0xff] }
 0x2ed   : > { %v1688_v25 = vpop.f32.mrf.mxu0  ;;  %v1711_v26 = vpop.f32.mrf.mxu1  ;;  %1889 = vmatpush.msrb.mxu0 %v1848_v12 }
 0x2ee   : > { %v1716_v29 = vadd.f32 %v1688_v25, %v1630_v23  ;;  %v1717_v30 = vadd.f32 %v1711_v26, %v1631_v24  ;;  %v2617_v23 = vld [vmem:[%s4312_s9 + $0x78] sm:$0xff]  ;;  %v1961_v24 = vld [vmem:[%s4312_s9 + $0x20] sm:$0xff]  ;;  %v2616_v25 = vld [vmem:[%s4312_s9 + $0x70] sm:$0xff] }
 0x2ef   : > { %1890 = vmatpush.msrb.mxu0 %v1847_v13  ;;  %1993 = vmatpush.msra.mxu1 %v2617_v23  ;;  %v1960_v26 = vld [vmem:[%s4312_s9 + $0x18] sm:$0xff]  ;;  %v2141_v23 = vld [vmem:[%s4314_s11 + $0x40] sm:$0xff] }
 0x2f0   : > { %v1726_v35 = vadd.f32 %v1720_v22, %v1716_v29  ;;  %v1727_v37 = vadd.f32 %v1721_v34, %v1717_v30  ;;  %v1962_v22 = vld [vmem:[%s4312_s9 + $0x28] sm:$0xff]  ;;  %v2614_v29 = vld [vmem:[%s4312_s9 + $0x60] sm:$0xff] }
 0x2f1   : > { %1994 = vmatpush.msra.mxu1 %v2616_v25  ;;  %v2633_v34 = vld [vmem:[%s4312_s9 + $0xe8] sm:$0xff]  ;;  %v2139_v25 = vld [vmem:[%s4314_s11 + $0x30] sm:$0xff] }
 0x2f2   : > { %v1730_v36 = vmax.f32 %v1726_v35, 0.0  ;;  %v1731_v46 = vmax.f32 %v1727_v37, 0.0 }
 0x2f3   : > { %1995 = vmatpush.msra.mxu1 %v2615_v27  ;;  %v2137_v27 = vld [vmem:[%s4314_s11 + $0x20] sm:$0xff] }
 0x2f4   : > { %2581 = vmatpush.msk.msrb.mxu3 %vm1737_vm8, %v1730_v36  ;;  %2586 = vmatpush.msk.msrb.mxu2 %vm1737_vm8, %v1730_v36 }
 0x2f5   : > { %1996 = vmatpush.msra.mxu1 %v2614_v29  ;;  %v2135_v29 = vld [vmem:[%s4314_s11 + $0x10] sm:$0xff] }
 0x2f6   : > { %1759 = vmatpush.msrb.mxu3 %v1728_v41  ;;  %1804 = vmatpush.msrb.mxu2 %v1728_v41  ;;  %v1957_v41 = vld [vmem:[%s4312_s9] sm:$0xff] }
 0x2f7   : > { %2582 = vmatmul.msk.f32.vlgmr.msrb.gmra.mxu3 %vm1733_vm9, %v1732_v43  ;;  %2587 = vmatmul.msk.f32.vlgmr.msrb.gmra.mxu2 %vm1733_vm9, %v2585_v44 }
 0x2f8   : > { %2583 = vmatpush.msk.msra.mxu3 %vm1737_vm8, %v1731_v46  ;;  %1916 = vmatpush.msra.mxu2 %v2606_v45  ;;  %v2631_v45 = vld [vmem:[%s4312_s9 + $0xd8] sm:$0xff] }
 0x2f9   : > { %1997 = vmatpush.msra.mxu1 %v2613_v40  ;;  %v2178_v40 = vld [vmem:[%s4316_s13 + $0x20] sm:$0xff] }
 0x2fa   : > { %1779 = vmatpush.msra.mxu3 %v1729_v48  ;;  %1917 = vmatpush.msra.mxu2 %v2605_v47  ;;  %v2654_v47 = vld [vmem:[%s4312_s9 + $0x180] sm:$0xff] }
 0x2fc   : > { %2588 = vmatpush.msk.msrb.mxu3 %vm1737_vm8, %v1731_v46  ;;  %1918 = vmatpush.msra.mxu2 %v2604_v49  ;;  %v2644_v46 = vld [vmem:[%s4312_s9 + $0x138] sm:$0xff]  ;;  %v2643_v49 = vld [vmem:[%s4312_s9 + $0x130] sm:$0xff] }
 0x2fe   : > { %1824 = vmatpush.msrb.mxu3 %v1729_v48  ;;  %1919 = vmatpush.msra.mxu2 %v2603_v50  ;;  %v2630_v48 = vld [vmem:[%s4312_s9 + $0xd0] sm:$0xff]  ;;  %v2653_v50 = vld [vmem:[%s4312_s9 + $0x178] sm:$0xff] }
 0x2ff   : > { %2584 = vmatmul.msk.f32.vlgmr.msra.gmra.mxu3 %vm1733_vm9, %v1732_v43  ;;  %v2655_v43 = vld [vmem:[%s4312_s9 + $0x188] sm:$0xff] }
 0x300   : > { %1920 = vmatpush.msra.mxu2 %v2602_v51  ;;  %1948 = vmatpush.msra.mxu3 %v2610_v7  ;;  %v2629_v51 = vld [vmem:[%s4312_s9 + $0xc8] sm:$0xff]  ;;  %v2147_v7 = vld [vmem:[%s4314_s11 + $0x70] sm:$0xff] }
 0x302   : > { %1921 = vmatpush.msra.mxu2 %v2601_v52  ;;  %1949 = vmatpush.msra.mxu3 %v2609_v8  ;;  %v2628_v52 = vld [vmem:[%s4312_s9 + $0xc0] sm:$0xff]  ;;  %v2146_v8 = vld [vmem:[%s4314_s11 + $0x68] sm:$0xff] }
 0x304   : > { %1922 = vmatpush.msra.mxu2 %v2600_v54  ;;  %1950 = vmatpush.msra.mxu3 %v2608_v11  ;;  %v2642_v54 = vld [vmem:[%s4312_s9 + $0x128] sm:$0xff]  ;;  %v2143_v11 = vld [vmem:[%s4314_s11 + $0x50] sm:$0xff] }
 0x306   : > { %1923 = vmatpush.msra.mxu2 %v2599_v56  ;;  %1951 = vmatpush.msra.mxu3 %v2607_v4  ;;  %v2627_v56 = vld [vmem:[%s4312_s9 + $0xb8] sm:$0xff] }
 0x307   : > { %2589 = vmatmul.msk.f32.vlgmr.msrb.gmra.mxu3 %vm1733_vm9, %v2585_v44  ;;  %v2612_v44 = vld [vmem:[%s4312_s9 + $0x50] sm:$0xff] }
 0x308   : > { %1924 = vmatpush.msra.mxu2 %v2598_v39  ;;  %2011 = vmatpush.msrb.mxu3 %v1966_v14  ;;  %v2651_v39 = vld [vmem:[%s4312_s9 + $0x168] sm:$0xff] }
 0x309   : > { %1998 = vmatpush.msra.mxu1 %v2612_v44 }
 0x30a   : > { %1925 = vmatpush.msra.mxu2 %v2597_v58  ;;  %2012 = vmatpush.msrb.mxu3 %v1965_v16  ;;  %v2640_v58 = vld [vmem:[%s4312_s9 + $0x118] sm:$0xff] }
 0x30b   : > { %2080 = vmatpush.msrb.mxu1 %v2644_v46 }
 0x30c   : > { %1926 = vmatpush.msra.mxu2 %v2596_v60  ;;  %2013 = vmatpush.msrb.mxu3 %v1964_v18  ;;  %v2625_v60 = vld [vmem:[%s4312_s9 + $0xa8] sm:$0xff] }
 0x30d   : > { %2081 = vmatpush.msrb.mxu1 %v2643_v49 }
 0x30e   : > { %1927 = vmatpush.msra.mxu2 %v2595_v62  ;;  %2014 = vmatpush.msrb.mxu3 %v1963_v20  ;;  %v2649_v62 = vld [vmem:[%s4312_s9 + $0x158] sm:$0xff] }
 0x30f   : > { %2082 = vmatpush.msrb.mxu1 %v2642_v54 }
 0x310   : > { %1928 = vmatpush.msra.mxu2 %v2594_v0  ;;  %2015 = vmatpush.msrb.mxu3 %v1962_v22  ;;  %v2638_v0 = vld [vmem:[%s4312_s9 + $0x108] sm:$0xff] }
 0x311   : > { %2083 = vmatpush.msrb.mxu1 %v2641_v38  ;;  %v2142_v22 = vld [vmem:[%s4314_s11 + $0x48] sm:$0xff]  ;;  %v2174_v38 = vld [vmem:[%s4316_s13] sm:$0xff] }
 0x312   : > { %1929 = vmatpush.msra.mxu2 %v2593_v1  ;;  %2016 = vmatpush.msrb.mxu3 %v1961_v24  ;;  %v2637_v1 = vld [vmem:[%s4312_s9 + $0x100] sm:$0xff]  ;;  %v2140_v24 = vld [vmem:[%s4314_s11 + $0x38] sm:$0xff] }
 0x313   : > { %2084 = vmatpush.msrb.mxu1 %v2640_v58 }
 0x314   : > { %1930 = vmatpush.msra.mxu2 %v2592_v3  ;;  %2017 = vmatpush.msrb.mxu3 %v1960_v26  ;;  %v2636_v3 = vld [vmem:[%s4312_s9 + $0xf8] sm:$0xff]  ;;  %v2138_v26 = vld [vmem:[%s4314_s11 + $0x28] sm:$0xff] }
 0x315   : > { %2085 = vmatpush.msrb.mxu1 %v2639_v61 }
 0x316   : > { %1931 = vmatpush.msra.mxu2 %v2591_v6  ;;  %2018 = vmatpush.msrb.mxu3 %v1959_v28  ;;  %v2635_v6 = vld [vmem:[%s4312_s9 + $0xf0] sm:$0xff]  ;;  %v2136_v28 = vld [vmem:[%s4314_s11 + $0x18] sm:$0xff] }
 0x317   : > { %2086 = vmatpush.msrb.mxu1 %v2638_v0 }
 0x318   : > { %2019 = vmatpush.msrb.mxu3 %v1958_v33  ;;  %2154 = vmatpush.msrb.mxu2 %v2147_v7  ;;  %v2183_v33 = vld [vmem:[%s4316_s13 + $0x48] sm:$0xff] }
 0x319   : > { %2087 = vmatpush.msrb.mxu1 %v2637_v1 }
 0x31a   : > { %2020 = vmatpush.msrb.mxu3 %v1957_v41  ;;  %2155 = vmatpush.msrb.mxu2 %v2146_v8  ;;  %v2177_v41 = vld [vmem:[%s4316_s13 + $0x18] sm:$0xff] }
 0x31b   : > { %2088 = vmatpush.msrb.mxu1 %v2636_v3 }
 0x31c   : > { %2156 = vmatpush.msrb.mxu2 %v2145_v9 }
 0x31d   : > { %2089 = vmatpush.msrb.mxu1 %v2635_v6 }
 0x31e   : > { %2157 = vmatpush.msrb.mxu2 %v2144_v10 }
 0x320   : > { %2158 = vmatpush.msrb.mxu2 %v2143_v11 }
 0x322   : > { %2159 = vmatpush.msrb.mxu2 %v2142_v22 }
 0x324   : > { %2160 = vmatpush.msrb.mxu2 %v2141_v23 }
 0x326   : > { %2161 = vmatpush.msrb.mxu2 %v2140_v24 }
 0x328   : > { %2162 = vmatpush.msrb.mxu2 %v2139_v25 }
 0x32a   : > { %2163 = vmatpush.msrb.mxu2 %v2138_v26 }
 0x32c   : > { %2164 = vmatpush.msrb.mxu2 %v2137_v27 }
 0x32e   : > { %2165 = vmatpush.msrb.mxu2 %v2136_v28 }
 0x330   : > { %2166 = vmatpush.msrb.mxu2 %v2135_v29 }
 0x37a   : > { %v1761_v30 = vpop.f32.mrf.mxu3  ;;  %v1806_v31 = vpop.f32.mrf.mxu2 }
 0x37b   : > { %v1829_v32 = vmax.f32 %v1761_v30, %v1806_v31  ;;  %v2134_v30 = vld [vmem:[%s4314_s11 + $0x8] sm:$0xff]  ;;  %v2133_v31 = vld [vmem:[%s4314_s11] sm:$0xff] }
 0x37c   : > { %2167 = vmatpush.msrb.mxu2 %v2134_v30 }
 0x37d   : > { %1871 = vmatmul.f32.vlgmr.msra.gmra.mxu0 %v1829_v32  ;;  %1932 = vmatmul.f32.vlgmr.msra.gmra.mxu2 %v1829_v32  ;;  %v2184_v32 = vld [vmem:[%s4316_s13 + $0x50] sm:$0xf] }
 0x37e   : > { %2045 = vmatpush.msra.mxu0 %v2633_v34  ;;  %2168 = vmatpush.msrb.mxu2 %v2133_v31  ;;  %v2182_v34 = vld [vmem:[%s4316_s13 + $0x40] sm:$0xff] }
 0x380   : > { %2046 = vmatpush.msra.mxu0 %v2632_v42 }
 0x382   : > { %v1781_v35 = vpop.f32.mrf.mxu3  ;;  %2047 = vmatpush.msra.mxu0 %v2631_v45 }
 0x384   : > { %2048 = vmatpush.msra.mxu0 %v2630_v48 }
 0x386   : > { %2049 = vmatpush.msra.mxu0 %v2629_v51 }
 0x388   : > { %2050 = vmatpush.msra.mxu0 %v2628_v52 }
 0x38a   : > { %v1826_v36 = vpop.f32.mrf.mxu3  ;;  %2051 = vmatpush.msra.mxu0 %v2627_v56  ;;  %v2175_v56 = vld [vmem:[%s4316_s13 + $0x8] sm:$0xff] }
 0x38b   : > { %v1830_v37 = vmax.f32 %v1781_v35, %v1826_v36  ;;  %v2181_v35 = vld [vmem:[%s4316_s13 + $0x38] sm:$0xff]  ;;  %v2180_v36 = vld [vmem:[%s4316_s13 + $0x30] sm:$0xff] }
 0x38c   : > { %2052 = vmatpush.msra.mxu0 %v2626_v57 }
 0x38d   : > { %2611 = vmatmul.msk.f32.vlgmr.msra.gmra.mxu3 %vm1851_vm10, %v1830_v37  ;;  %2590 = vmatmul.msk.f32.vlgmr.msrb.gmra.mxu0 %vm1851_vm10, %v1830_v37  ;;  %v2179_v37 = vld [vmem:[%s4316_s13 + $0x28] sm:$0xff] }
 0x38e   : > { %2115 = vmatpush.msra.mxu3 %v2655_v43  ;;  %2053 = vmatpush.msra.mxu0 %v2625_v60  ;;  %v2185_v60 = vld [vmem:[%s4317_s14] sm:$0x1] }
 0x390   : > { %2116 = vmatpush.msra.mxu3 %v2654_v47  ;;  %2054 = vmatpush.msra.mxu0 %v2624_v63 }
 0x392   : > { %2117 = vmatpush.msra.mxu3 %v2653_v50  ;;  %2658 = vmatpush.msk.msrb.mxu0 %vm929_vm4, %v2184_v32  ;;  %v2130_v50 = vld [vmem:[%s4313_s10] sm:$0x1] }
 0x394   : > { %2118 = vmatpush.msra.mxu3 %v2652_v55  ;;  %2198 = vmatpush.msrb.mxu0 %v2183_v33  ;;  %v2176_v55 = vld [vmem:[%s4316_s13 + $0x10] sm:$0xff] }
 0x396   : > { %2119 = vmatpush.msra.mxu3 %v2651_v39  ;;  %2199 = vmatpush.msrb.mxu0 %v2182_v34  ;;  %v2148_v39 = vld [vmem:[%s4315_s12] sm:$0x1] }
 0x398   : > { %2120 = vmatpush.msra.mxu3 %v2650_v59  ;;  %2200 = vmatpush.msrb.mxu0 %v2181_v35 }
 0x39a   : > { %2121 = vmatpush.msra.mxu3 %v2649_v62  ;;  %2201 = vmatpush.msrb.mxu0 %v2180_v36 }
 0x39c   : > { %2122 = vmatpush.msra.mxu3 %v2648_v53  ;;  %2202 = vmatpush.msrb.mxu0 %v2179_v37 }
 0x39e   : > { %2123 = vmatpush.msra.mxu3 %v2647_v2  ;;  %2203 = vmatpush.msrb.mxu0 %v2178_v40 }
 0x3a0   : > { %2124 = vmatpush.msra.mxu3 %v2646_v5  ;;  %2204 = vmatpush.msrb.mxu0 %v2177_v41 }
 0x3a2   : > { %2205 = vmatpush.msrb.mxu0 %v2176_v55 }
 0x3a4   : > { %2206 = vmatpush.msrb.mxu0 %v2175_v56 }
 0x3a6   : > { %2207 = vmatpush.msrb.mxu0 %v2174_v38 }
 0x3fa   : > { %v1872_v12 = vpop.f32.mrf.mxu0 }
 0x400   : > { %v1933_v13 = vpop.f32.mrf.mxu2 }
 0x40a   : > { %v1892_v4 = vpop.f32.mrf.mxu0 }
 0x40b   : > { %v1893_v15 = vadd.f32 %v1892_v4, %v1872_v12 }
 0x410   : > { %v1953_v14 = vpop.f32.mrf.mxu3 }
 0x411   : > { %v1954_v16 = vadd.f32 %v1953_v14, %v1933_v13 }
 0x413   : > { %v1956_v17 = vmax.f32 %v1893_v15, %v1954_v16 }
 0x415   : > { %2623 = vmatmul.msk.f32.vlgmr.msrb.gmra.mxu3 %vm1980_vm11, %v1956_v17  ;;  %v1979_v18 = vrot.slane %v1956_v17, 1  ;;  %v2036_v19 = vrot.slane %v1956_v17, 2  ;;  %v2106_v20 = vrot.slane %v1956_v17, 4  ;;  %v2071_v21 = vrot.slane %v1956_v17, 3 }
 0x417   : > { %2622 = vmatmul.msk.f32.vlgmr.msra.gmra.mxu1 %vm1980_vm11, %v1979_v18  ;;  %2634 = vmatmul.msk.f32.vlgmr.msra.gmra.mxu0 %vm1980_vm11, %v2036_v19 }
 0x41d   : > { %2656 = vmatmul.msk.f32.vlgmr.msra.gmra.mxu3 %vm1980_vm11, %v2106_v20 }
 0x41f   : > { %2645 = vmatmul.msk.f32.vlgmr.msrb.gmra.mxu1 %vm1980_vm11, %v2071_v21 }
 0x494   : > { %v2000_v42 = vpop.f32.mrf.mxu1  ;;  %v2056_v45 = vpop.f32.mrf.mxu0 }
 0x498   : > { %v2022_v43 = vpop.f32.mrf.mxu3 }
 0x499   : > { %v2023_v44 = vadd.f32 %v2022_v43, %v2000_v42 }
 0x49b   : > { %v2059_v46 = vadd.f32 %v2056_v45, %v2023_v44 }
 0x49c   : > { %v2091_v47 = vpop.f32.mrf.mxu1 }
 0x49d   : > { %v2094_v48 = vadd.f32 %v2091_v47, %v2059_v46 }
 0x4a0   : > { %v2126_v49 = vpop.f32.mrf.mxu3 }
 0x4a1   : > { %v2129_v51 = vadd.f32 %v2126_v49, %v2094_v48 }
 0x4a3   : > { %v2131_v52 = vadd.f32 %v2130_v50, %v2129_v51 }
 0x4a5   : > { %v2132_v54 = vmax.f32 %v2131_v52, 0.0 }
 0x4a7   : > { %2657 = vmatmul.msk.f32.vlgmr.msrb.gmra.mxu2 %vm2149_vm12, %v2132_v54 }
 0x52a   : > { %v2170_v57 = vpop.f32.mrf.mxu2 }
 0x52b   : > { %v2171_v58 = vadd.f32 %v2170_v57, %v2148_v39 }
 0x52d   : > { %v2173_v59 = vmax.f32 %v2171_v58, 0.0 }
 0x52f   : > { %2659 = vmatmul.msk.f32.vlgmr.msrb.gmra.mxu0 %vm1347_vm7, %v2173_v59 }
 0x5ac   : > { %v2209_v61 = vpop.f32.mrf.mxu0 }
 0x5ad   : > { %v2210_v62 = vadd.f32 %v2209_v61, %v2185_v60 }
 0x5af   : > { %2213 = vst.msk [vmem:[%s486_s27] sm:$0x1] %vm2212_vm13, %v2210_v62 }
 0x5b0   : > { %2729 = shalt.err (!%p2726_p3)
}
 0x5b1   : > { %2663 = dma.vmem_to_hbm [thread:$0]  (%p2884_p5), %s2226_s24, 16, %s2228_s29, %s2215_s30  }
 0x5b2 PF: > { %s4335_s17 = sld [smem:[#allocation7_spill]] }
 0x5b3   : > { %s4336_s26 = sld [smem:[#allocation5_spill]] }
 0x5b8   : > { %p2669_p4 = scmp.ge.s32.totalorder %s4335_s17, 2 }
 0x5b9   : > { %s2239_s0 = sand.u32 1, %s4336_s26  }
 0x5ba   : > { %p2666_p7 = pnand %p2669_p4, %p2888_p6  ;;  %s2240_s22 = scalar_lea.sflag [#allocation3], %s2239_s0 }
 0x5bc   : > { %p2667_p8 = pneg %p2666_p7 }
 0x5be   : > { %2747 = dma.done.wait (%p2667_p8), %s2240_s22, 16  }
 0x5bf   : > { %2749 = vsyncadd (%p2667_p8), %s2240_s22, 4294967280  ;;  %s4338_s21 = sld [smem:[#allocation8_spill]]  ;;  %s4341_s18 = smov %s2756_s19 }
 0x5c0   : > { %s4339_s16 = sld [smem:[#allocation6_spill]] }
 0x5c1   : > { %s4340_s20 = sld [smem:[#allocation9_spill]] }
 0x5c5   : > { %p25_p9 = scmp.ge.s32.totalorder %s4338_s21, 4  }
 0x5c6   : > { %s4342_s19 = smov %s4339_s16 }
 0x5c7   :  { %27 = sbr.rel (!%p25_p9) target bundleno = 5 (0x5), region = 131 }
 0x5cc   :  { %2245 = vsyncpa [#allocation3], 1 }
 0x5cd   :  { %2247 = vsyncpa [#allocation3 + $0x1], 1 }

</bundles_post_ra>
